<compile_context>
chip_gen: v6e
topology: v6e:2x2x1
jax: 0.10.0
libtpu: 0.0.40
codegen_flags: <defaults>
</compile_context>

<pallas_src>
import jax
import jax.numpy as jnp
from jax import lax
from jax.experimental import pallas as pl
from jax.experimental.pallas import tpu as pltpu


def _make_lstm_kernel(T, dimh_p, unroll):
    """Build the kernel for a sequence length T (static) and padded hidden width."""

    def kernel(x_ref, wh_ref, wx_ref, b_ref, out_ref, xg_ref):
        # Row 0 (initial hidden state) and all sublane-padding rows are zero.
        out_ref[...] = jnp.zeros_like(out_ref)

        # Hoisted input projection: one GEMM for the whole (padded) sequence,
        # staged in VMEM scratch so per-step access is a cheap row load.
        xg_ref[...] = (
            jnp.dot(x_ref[...], wx_ref[...], preferred_element_type=jnp.float32)
            + b_ref[...]
        )

        def step_math(h, c, gates):
            # Gate order [f, i, c, o].  f/i/o weights were pre-scaled by 0.5 in
            # the wrapper, so sigmoid(z) = 0.5 * tanh(z/2) + 0.5 needs only the
            # single fused tanh below (one EUP pass over the gate row).
            t = jnp.tanh(gates)
            ft = 0.5 * t[:, 0 * dimh_p:1 * dimh_p] + 0.5
            it = 0.5 * t[:, 1 * dimh_p:2 * dimh_p] + 0.5
            cb = t[:, 2 * dimh_p:3 * dimh_p]
            ot = 0.5 * t[:, 3 * dimh_p:4 * dimh_p] + 0.5
            c_new = ft * c + it * cb
            h_new = ot * jnp.tanh(c_new)
            return h_new, c_new

        # TODO(synk): stage Wh in MXU weight registers once via
        # pltpu.matmul_push_rhs / matmul_acc_lhs / matmul_pop instead of a
        # jnp.dot per step; skipped here to keep lowering portable across
        # v5e (4x128^2) and v6e/v7x (2x256^2) MXU geometries.
        def one_step(t_idx, h, c):
            gates = (
                jnp.dot(h, wh_ref[...], preferred_element_type=jnp.float32)
                + xg_ref[pl.ds(t_idx, 1), :]
            )
            h_new, c_new = step_math(h, c, gates)
            # Lane-dense (1, dimh_p) row store; off the h->h critical path.
            out_ref[pl.ds(t_idx + 1, 1), :] = h_new
            return h_new, c_new

        h0 = jnp.zeros((1, dimh_p), jnp.float32)
        c0 = jnp.zeros((1, dimh_p), jnp.float32)

        if unroll >= T:
            # Tiny T: fully unrolled so the LLO scheduler sees every step.
            h, c = h0, c0
            for t in range(T):
                h, c = one_step(t, h, c)
        else:
            # Larger T: bounded code size / register pressure, 8-step windows.
            def body(t, carry):
                h, c = carry
                return one_step(t, h, c)

            lax.fori_loop(0, T, body, (h0, c0), unroll=unroll)

    return kernel


def my_lstm_forward(seq, params):
    """seq: (T, dimx) f32 (time-major, row t = x_t, matching `for x in seq`).
    params: (Wf, bf, Wi, bi, Wo, bo, Wc, bc) with W*: (dimh, dimh+dimx)
    [columns 0:dimh multiply ht, columns dimh: multiply x], b*: (dimh,).
    Returns ((T+1)*dimh,) = cat(h0=0, h1, ..., hT)."""
    Wf, bf, Wi, bi, Wo, bo, Wc, bc = params
    T, dimx = seq.shape
    dimh = Wf.shape[0]

    dimh_p = ((dimh + 127) // 128) * 128       # lane-align each gate block
    T_in_pad = ((T + 7) // 8) * 8              # sublane-align the input rows
    T_out = T + 1
    T_out_pad = ((T_out + 7) // 8) * 8         # sublane-align the output rows

    seq_p = jnp.zeros((T_in_pad, dimx), jnp.float32).at[:T, :].set(
        seq.astype(jnp.float32))

    def pack(W, b, scale):
        # Split the Linear weight into h-part / x-part, transpose, pre-scale
        # (0.5 for sigmoid-via-tanh gates), and zero-pad each gate to a
        # lane-aligned dimh_p-wide block.  Zero padding keeps padded lanes of
        # h and c exactly 0 through the recurrence.
        Wh = W[:, :dimh].T * scale              # (dimh, dimh)
        Wx = W[:, dimh:].T * scale              # (dimx, dimh)
        b_s = b * scale
        Wh_p = jnp.zeros((dimh_p, dimh_p), jnp.float32).at[:dimh, :dimh].set(Wh)
        Wx_p = jnp.zeros((dimx, dimh_p), jnp.float32).at[:, :dimh].set(Wx)
        b_p = jnp.zeros((dimh_p,), jnp.float32).at[:dimh].set(b_s)
        return Wh_p, Wx_p, b_p

    # Gate order [f, i, c, o]; f/i/o pre-scaled by 0.5 for sigmoid-via-tanh.
    packed = [pack(Wf, bf, 0.5), pack(Wi, bi, 0.5),
              pack(Wc, bc, 1.0), pack(Wo, bo, 0.5)]
    wh = jnp.concatenate([p[0] for p in packed], axis=1)    # (dimh_p, 4*dimh_p)
    wx = jnp.concatenate([p[1] for p in packed], axis=1)    # (dimx,  4*dimh_p)
    b = jnp.concatenate([p[2] for p in packed])[None, :]    # (1,     4*dimh_p)

    cost = pl.CostEstimate(
        flops=2 * T_in_pad * dimx * 4 * dimh_p          # hoisted input GEMM
        + 2 * T * dimh_p * 4 * dimh_p,                  # recurrent GEMVs
        transcendentals=5 * T * dimh_p,                 # 4 gate tanh + tanh(c)
        bytes_accessed=4 * (seq_p.size + wh.size + wx.size + b.size
                            + T_out_pad * dimh_p),
    )

    resident_bytes = 4 * (seq_p.size + wh.size + wx.size + b.size
                          + T_out_pad * dimh_p          # output
                          + T_in_pad * 4 * dimh_p)      # xg scratch
    # Explicit VMEM budget (v7x physical is 64 MiB); keep headroom, never
    # below the default scoped limit.
    vmem_limit = int(min(max(2 * resident_bytes + (1 << 20), 32 << 20), 60 << 20))

    unroll = T if T <= 16 else 8
    kernel = _make_lstm_kernel(T, dimh_p, unroll)

    # Single sequence -> strictly serial recurrence, so no grid is used.
    # TODO(synk): when batching independent sequences, make h/c (B, dimh_p) and
    # add a "parallel" batch grid axis so v7x's two TensorCores both get work.
    out = pl.pallas_call(
        kernel,
        out_shape=jax.ShapeDtypeStruct((T_out_pad, dimh_p), jnp.float32),
        in_specs=[pl.BlockSpec(memory_space=pltpu.MemorySpace.VMEM)] * 4,
        out_specs=pl.BlockSpec(memory_space=pltpu.MemorySpace.VMEM),
        scratch_shapes=[pltpu.VMEM((T_in_pad, 4 * dimh_p), jnp.float32)],
        compiler_params=pltpu.CompilerParams(vmem_limit_bytes=vmem_limit),
        cost_estimate=cost,
    )(seq_p, wh, wx, b)

    # Strip the lane/sublane padding before flattening (torch semantics).
    return out[:T_out, :dimh].reshape(-1)


def ref_forward(seq, params):
    """Pure-JAX reference reproducing MY_LSTM.forward semantics."""
    Wf, bf, Wi, bi, Wo, bo, Wc, bc = params
    dimh = Wf.shape[0]
    ht = jnp.zeros((dimh,), jnp.float32)
    Ct = jnp.zeros((dimh,), jnp.float32)
    h_parts = [jnp.zeros((dimh,), jnp.float32)]   # initial self.h
    for t in range(seq.shape[0]):
        x_ht = jnp.concatenate([ht, seq[t]])      # cat((ht, x), 0)
        ft = jax.nn.sigmoid(Wf @ x_ht + bf)
        it = jax.nn.sigmoid(Wi @ x_ht + bi)
        Ct = ft * Ct + it * jnp.tanh(Wc @ x_ht + bc)
        ot = jax.nn.sigmoid(Wo @ x_ht + bo)
        ht = ot * jnp.tanh(Ct)
        h_parts.append(ht)
    return jnp.concatenate(h_parts)


def _make_params(key, dimx, dimh):
    # deterministic init mimicking nn.Linear(dimx+dimh, dimh) default
    # (uniform in [-1/sqrt(fan_in), 1/sqrt(fan_in)])
    fan_in = dimx + dimh
    bound = 1.0 / (fan_in ** 0.5)
    ks = jax.random.split(key, 8)

    def lin_init(kw, kb):
        W = jax.random.uniform(kw, (dimh, fan_in), jnp.float32, -bound, bound)
        b = jax.random.uniform(kb, (dimh,), jnp.float32, -bound, bound)
        return W, b

    Wf, bf = lin_init(ks[0], ks[1])
    Wi, bi = lin_init(ks[2], ks[3])
    Wo, bo = lin_init(ks[4], ks[5])
    Wc, bc = lin_init(ks[6], ks[7])
    return (Wf, bf, Wi, bi, Wo, bo, Wc, bc)


if __name__ == "__main__":
    key = jax.random.PRNGKey(0)
    k1, k2 = jax.random.split(key)

    # Case 1: small T -> fully unrolled recurrence.
    dimx, dimh, T = 16, 32, 8
    kp, ks = jax.random.split(k1)
    params = _make_params(kp, dimx, dimh)
    seq = jax.random.normal(ks, (T, dimx), dtype=jnp.float32)
    out = jax.block_until_ready(my_lstm_forward(seq, params))
    ref = ref_forward(seq, params)
    assert out.shape == ((T + 1) * dimh,)
    assert jnp.allclose(out, ref, atol=5e-5, rtol=5e-5), (
        f"[T={T}] max abs err = {jnp.max(jnp.abs(out - ref))}"
    )

    # Case 2: larger T -> lax.fori_loop(unroll=8) recurrence path.
    dimx, dimh, T = 16, 32, 40
    kp, ks = jax.random.split(k2)
    params = _make_params(kp, dimx, dimh)
    seq = jax.random.normal(ks, (T, dimx), dtype=jnp.float32)
    out = jax.block_until_ready(my_lstm_forward(seq, params))
    ref = ref_forward(seq, params)
    assert out.shape == ((T + 1) * dimh,)
    assert jnp.allclose(out, ref, atol=5e-5, rtol=5e-5), (
        f"[T={T}] max abs err = {jnp.max(jnp.abs(out - ref))}"
    )

    print("KERNEL_OK")
</pallas_src>

<mosaic_0001>
module attributes {stable_mosaic.version = 11 : i64} {
  func.func @kernel(%arg0: memref<8x16xf32, #tpu.memory_space<vmem>>, %arg1: memref<128x512xf32, #tpu.memory_space<vmem>>, %arg2: memref<16x512xf32, #tpu.memory_space<vmem>>, %arg3: memref<1x512xf32, #tpu.memory_space<vmem>>, %arg4: memref<16x128xf32, #tpu.memory_space<vmem>>, %arg5: memref<8x512xf32, #tpu.memory_space<vmem>>) attributes {dimension_semantics = [], scalar_prefetch = 0 : i64, scratch_operands = 1 : i64, tpu.core_type = #tpu.core_type<tc>} {
    %cst = arith.constant 0.000000e+00 : f32
    %0 = vector.broadcast %cst : f32 to vector<16x128xf32>
    %c0 = arith.constant 0 : index
    %c0_0 = arith.constant 0 : index
    %1 = vector.load %arg4[%c0, %c0_0] : memref<16x128xf32, #tpu.memory_space<vmem>>, vector<16x128xf32>
    tpu.vector_store %arg4[%c0, %c0_0], %0 {strides = array<i32>} : memref<16x128xf32, #tpu.memory_space<vmem>>, vector<16x128xf32>,
    %c0_1 = arith.constant 0 : index
    %c0_2 = arith.constant 0 : index
    %2 = vector.load %arg0[%c0_1, %c0_2] : memref<8x16xf32, #tpu.memory_space<vmem>>, vector<8x16xf32>
    %c0_3 = arith.constant 0 : index
    %c0_4 = arith.constant 0 : index
    %3 = vector.load %arg2[%c0_3, %c0_4] : memref<16x512xf32, #tpu.memory_space<vmem>>, vector<16x512xf32>
    %cst_5 = arith.constant dense<0.000000e+00> : vector<8x512xf32>
    %4 = tpu.matmul %2, %3, %cst_5 {dimension_numbers = #tpu.dot_dimension_numbers<[1], [0], [0], [1], [0, 0, 1, 1], [], []>} : vector<8x16xf32>, vector<16x512xf32>, vector<8x512xf32> -> vector<8x512xf32>
    %c0_6 = arith.constant 0 : index
    %c0_7 = arith.constant 0 : index
    %5 = vector.load %arg3[%c0_6, %c0_7] : memref<1x512xf32, #tpu.memory_space<vmem>>, vector<1x512xf32>
    %6 = vector.broadcast %5 : vector<1x512xf32> to vector<8x512xf32>
    %7 = arith.addf %4, %6 : vector<8x512xf32>
    %c0_8 = arith.constant 0 : index
    %c0_9 = arith.constant 0 : index
    %8 = vector.load %arg5[%c0_8, %c0_9] : memref<8x512xf32, #tpu.memory_space<vmem>>, vector<8x512xf32>
    tpu.vector_store %arg5[%c0_8, %c0_9], %7 {strides = array<i32>} : memref<8x512xf32, #tpu.memory_space<vmem>>, vector<8x512xf32>,
    %cst_10 = arith.constant 0.000000e+00 : f32
    %9 = vector.broadcast %cst_10 : f32 to vector<1x128xf32>
    %cst_11 = arith.constant 0.000000e+00 : f32
    %10 = vector.broadcast %cst_11 : f32 to vector<1x128xf32>
    %c0_12 = arith.constant 0 : index
    %c0_13 = arith.constant 0 : index
    %11 = vector.load %arg1[%c0_12, %c0_13] : memref<128x512xf32, #tpu.memory_space<vmem>>, vector<128x512xf32>
    %cst_14 = arith.constant dense<0.000000e+00> : vector<1x512xf32>
    %12 = tpu.matmul %9, %11, %cst_14 {dimension_numbers = #tpu.dot_dimension_numbers<[1], [0], [0], [1], [0, 0, 1, 1], [], []>} : vector<1x128xf32>, vector<128x512xf32>, vector<1x512xf32> -> vector<1x512xf32>
    %c0_15 = arith.constant 0 : index
    %c0_16 = arith.constant 0 : index
    %13 = vector.load %arg5[%c0_15, %c0_16] : memref<8x512xf32, #tpu.memory_space<vmem>>, vector<1x512xf32>
    %14 = arith.addf %12, %13 : vector<1x512xf32>
    %15 = math.tanh %14 : vector<1x512xf32>
    %16 = vector.extract_strided_slice %15 {offsets = [0, 0], sizes = [1, 128], strides = [1, 1]} : vector<1x512xf32> to vector<1x128xf32>
    %cst_17 = arith.constant 5.000000e-01 : f32
    %17 = vector.broadcast %cst_17 : f32 to vector<1x128xf32>
    %18 = arith.mulf %17, %16 : vector<1x128xf32>
    %cst_18 = arith.constant 5.000000e-01 : f32
    %19 = vector.broadcast %cst_18 : f32 to vector<1x128xf32>
    %20 = arith.addf %18, %19 : vector<1x128xf32>
    %21 = vector.extract_strided_slice %15 {offsets = [0, 128], sizes = [1, 128], strides = [1, 1]} : vector<1x512xf32> to vector<1x128xf32>
    %cst_19 = arith.constant 5.000000e-01 : f32
    %22 = vector.broadcast %cst_19 : f32 to vector<1x128xf32>
    %23 = arith.mulf %22, %21 : vector<1x128xf32>
    %cst_20 = arith.constant 5.000000e-01 : f32
    %24 = vector.broadcast %cst_20 : f32 to vector<1x128xf32>
    %25 = arith.addf %23, %24 : vector<1x128xf32>
    %26 = vector.extract_strided_slice %15 {offsets = [0, 256], sizes = [1, 128], strides = [1, 1]} : vector<1x512xf32> to vector<1x128xf32>
    %27 = vector.extract_strided_slice %15 {offsets = [0, 384], sizes = [1, 128], strides = [1, 1]} : vector<1x512xf32> to vector<1x128xf32>
    %cst_21 = arith.constant 5.000000e-01 : f32
    %28 = vector.broadcast %cst_21 : f32 to vector<1x128xf32>
    %29 = arith.mulf %28, %27 : vector<1x128xf32>
    %cst_22 = arith.constant 5.000000e-01 : f32
    %30 = vector.broadcast %cst_22 : f32 to vector<1x128xf32>
    %31 = arith.addf %29, %30 : vector<1x128xf32>
    %32 = arith.mulf %20, %10 : vector<1x128xf32>
    %33 = arith.mulf %25, %26 : vector<1x128xf32>
    %34 = arith.addf %32, %33 : vector<1x128xf32>
    %35 = math.tanh %34 : vector<1x128xf32>
    %36 = arith.mulf %31, %35 : vector<1x128xf32>
    %c1 = arith.constant 1 : index
    %c0_23 = arith.constant 0 : index
    %37 = vector.load %arg4[%c1, %c0_23] : memref<16x128xf32, #tpu.memory_space<vmem>>, vector<1x128xf32>
    tpu.vector_store %arg4[%c1, %c0_23], %36 {strides = array<i32>} : memref<16x128xf32, #tpu.memory_space<vmem>>, vector<1x128xf32>,
    %c0_24 = arith.constant 0 : index
    %c0_25 = arith.constant 0 : index
    %38 = vector.load %arg1[%c0_24, %c0_25] : memref<128x512xf32, #tpu.memory_space<vmem>>, vector<128x512xf32>
    %cst_26 = arith.constant dense<0.000000e+00> : vector<1x512xf32>
    %39 = tpu.matmul %36, %38, %cst_26 {dimension_numbers = #tpu.dot_dimension_numbers<[1], [0], [0], [1], [0, 0, 1, 1], [], []>} : vector<1x128xf32>, vector<128x512xf32>, vector<1x512xf32> -> vector<1x512xf32>
    %c1_27 = arith.constant 1 : index
    %c0_28 = arith.constant 0 : index
    %40 = vector.load %arg5[%c1_27, %c0_28] : memref<8x512xf32, #tpu.memory_space<vmem>>, vector<1x512xf32>
    %41 = arith.addf %39, %40 : vector<1x512xf32>
    %42 = math.tanh %41 : vector<1x512xf32>
    %43 = vector.extract_strided_slice %42 {offsets = [0, 0], sizes = [1, 128], strides = [1, 1]} : vector<1x512xf32> to vector<1x128xf32>
    %cst_29 = arith.constant 5.000000e-01 : f32
    %44 = vector.broadcast %cst_29 : f32 to vector<1x128xf32>
    %45 = arith.mulf %44, %43 : vector<1x128xf32>
    %cst_30 = arith.constant 5.000000e-01 : f32
    %46 = vector.broadcast %cst_30 : f32 to vector<1x128xf32>
    %47 = arith.addf %45, %46 : vector<1x128xf32>
    %48 = vector.extract_strided_slice %42 {offsets = [0, 128], sizes = [1, 128], strides = [1, 1]} : vector<1x512xf32> to vector<1x128xf32>
    %cst_31 = arith.constant 5.000000e-01 : f32
    %49 = vector.broadcast %cst_31 : f32 to vector<1x128xf32>
    %50 = arith.mulf %49, %48 : vector<1x128xf32>
    %cst_32 = arith.constant 5.000000e-01 : f32
    %51 = vector.broadcast %cst_32 : f32 to vector<1x128xf32>
    %52 = arith.addf %50, %51 : vector<1x128xf32>
    %53 = vector.extract_strided_slice %42 {offsets = [0, 256], sizes = [1, 128], strides = [1, 1]} : vector<1x512xf32> to vector<1x128xf32>
    %54 = vector.extract_strided_slice %42 {offsets = [0, 384], sizes = [1, 128], strides = [1, 1]} : vector<1x512xf32> to vector<1x128xf32>
    %cst_33 = arith.constant 5.000000e-01 : f32
    %55 = vector.broadcast %cst_33 : f32 to vector<1x128xf32>
    %56 = arith.mulf %55, %54 : vector<1x128xf32>
    %cst_34 = arith.constant 5.000000e-01 : f32
    %57 = vector.broadcast %cst_34 : f32 to vector<1x128xf32>
    %58 = arith.addf %56, %57 : vector<1x128xf32>
    %59 = arith.mulf %47, %34 : vector<1x128xf32>
    %60 = arith.mulf %52, %53 : vector<1x128xf32>
    %61 = arith.addf %59, %60 : vector<1x128xf32>
    %62 = math.tanh %61 : vector<1x128xf32>
    %63 = arith.mulf %58, %62 : vector<1x128xf32>
    %c2 = arith.constant 2 : index
    %c0_35 = arith.constant 0 : index
    %64 = vector.load %arg4[%c2, %c0_35] : memref<16x128xf32, #tpu.memory_space<vmem>>, vector<1x128xf32>
    tpu.vector_store %arg4[%c2, %c0_35], %63 {strides = array<i32>} : memref<16x128xf32, #tpu.memory_space<vmem>>, vector<1x128xf32>,
    %c0_36 = arith.constant 0 : index
    %c0_37 = arith.constant 0 : index
    %65 = vector.load %arg1[%c0_36, %c0_37] : memref<128x512xf32, #tpu.memory_space<vmem>>, vector<128x512xf32>
    %cst_38 = arith.constant dense<0.000000e+00> : vector<1x512xf32>
    %66 = tpu.matmul %63, %65, %cst_38 {dimension_numbers = #tpu.dot_dimension_numbers<[1], [0], [0], [1], [0, 0, 1, 1], [], []>} : vector<1x128xf32>, vector<128x512xf32>, vector<1x512xf32> -> vector<1x512xf32>
    %c2_39 = arith.constant 2 : index
    %c0_40 = arith.constant 0 : index
    %67 = vector.load %arg5[%c2_39, %c0_40] : memref<8x512xf32, #tpu.memory_space<vmem>>, vector<1x512xf32>
    %68 = arith.addf %66, %67 : vector<1x512xf32>
    %69 = math.tanh %68 : vector<1x512xf32>
    %70 = vector.extract_strided_slice %69 {offsets = [0, 0], sizes = [1, 128], strides = [1, 1]} : vector<1x512xf32> to vector<1x128xf32>
    %cst_41 = arith.constant 5.000000e-01 : f32
    %71 = vector.broadcast %cst_41 : f32 to vector<1x128xf32>
    %72 = arith.mulf %71, %70 : vector<1x128xf32>
    %cst_42 = arith.constant 5.000000e-01 : f32
    %73 = vector.broadcast %cst_42 : f32 to vector<1x128xf32>
    %74 = arith.addf %72, %73 : vector<1x128xf32>
    %75 = vector.extract_strided_slice %69 {offsets = [0, 128], sizes = [1, 128], strides = [1, 1]} : vector<1x512xf32> to vector<1x128xf32>
    %cst_43 = arith.constant 5.000000e-01 : f32
    %76 = vector.broadcast %cst_43 : f32 to vector<1x128xf32>
    %77 = arith.mulf %76, %75 : vector<1x128xf32>
    %cst_44 = arith.constant 5.000000e-01 : f32
    %78 = vector.broadcast %cst_44 : f32 to vector<1x128xf32>
    %79 = arith.addf %77, %78 : vector<1x128xf32>
    %80 = vector.extract_strided_slice %69 {offsets = [0, 256], sizes = [1, 128], strides = [1, 1]} : vector<1x512xf32> to vector<1x128xf32>
    %81 = vector.extract_strided_slice %69 {offsets = [0, 384], sizes = [1, 128], strides = [1, 1]} : vector<1x512xf32> to vector<1x128xf32>
    %cst_45 = arith.constant 5.000000e-01 : f32
    %82 = vector.broadcast %cst_45 : f32 to vector<1x128xf32>
    %83 = arith.mulf %82, %81 : vector<1x128xf32>
    %cst_46 = arith.constant 5.000000e-01 : f32
    %84 = vector.broadcast %cst_46 : f32 to vector<1x128xf32>
    %85 = arith.addf %83, %84 : vector<1x128xf32>
    %86 = arith.mulf %74, %61 : vector<1x128xf32>
    %87 = arith.mulf %79, %80 : vector<1x128xf32>
    %88 = arith.addf %86, %87 : vector<1x128xf32>
    %89 = math.tanh %88 : vector<1x128xf32>
    %90 = arith.mulf %85, %89 : vector<1x128xf32>
    %c3 = arith.constant 3 : index
    %c0_47 = arith.constant 0 : index
    %91 = vector.load %arg4[%c3, %c0_47] : memref<16x128xf32, #tpu.memory_space<vmem>>, vector<1x128xf32>
    tpu.vector_store %arg4[%c3, %c0_47], %90 {strides = array<i32>} : memref<16x128xf32, #tpu.memory_space<vmem>>, vector<1x128xf32>,
    %c0_48 = arith.constant 0 : index
    %c0_49 = arith.constant 0 : index
    %92 = vector.load %arg1[%c0_48, %c0_49] : memref<128x512xf32, #tpu.memory_space<vmem>>, vector<128x512xf32>
    %cst_50 = arith.constant dense<0.000000e+00> : vector<1x512xf32>
    %93 = tpu.matmul %90, %92, %cst_50 {dimension_numbers = #tpu.dot_dimension_numbers<[1], [0], [0], [1], [0, 0, 1, 1], [], []>} : vector<1x128xf32>, vector<128x512xf32>, vector<1x512xf32> -> vector<1x512xf32>
    %c3_51 = arith.constant 3 : index
    %c0_52 = arith.constant 0 : index
    %94 = vector.load %arg5[%c3_51, %c0_52] : memref<8x512xf32, #tpu.memory_space<vmem>>, vector<1x512xf32>
    %95 = arith.addf %93, %94 : vector<1x512xf32>
    %96 = math.tanh %95 : vector<1x512xf32>
    %97 = vector.extract_strided_slice %96 {offsets = [0, 0], sizes = [1, 128], strides = [1, 1]} : vector<1x512xf32> to vector<1x128xf32>
    %cst_53 = arith.constant 5.000000e-01 : f32
    %98 = vector.broadcast %cst_53 : f32 to vector<1x128xf32>
    %99 = arith.mulf %98, %97 : vector<1x128xf32>
    %cst_54 = arith.constant 5.000000e-01 : f32
    %100 = vector.broadcast %cst_54 : f32 to vector<1x128xf32>
    %101 = arith.addf %99, %100 : vector<1x128xf32>
    %102 = vector.extract_strided_slice %96 {offsets = [0, 128], sizes = [1, 128], strides = [1, 1]} : vector<1x512xf32> to vector<1x128xf32>
    %cst_55 = arith.constant 5.000000e-01 : f32
    %103 = vector.broadcast %cst_55 : f32 to vector<1x128xf32>
    %104 = arith.mulf %103, %102 : vector<1x128xf32>
    %cst_56 = arith.constant 5.000000e-01 : f32
    %105 = vector.broadcast %cst_56 : f32 to vector<1x128xf32>
    %106 = arith.addf %104, %105 : vector<1x128xf32>
    %107 = vector.extract_strided_slice %96 {offsets = [0, 256], sizes = [1, 128], strides = [1, 1]} : vector<1x512xf32> to vector<1x128xf32>
    %108 = vector.extract_strided_slice %96 {offsets = [0, 384], sizes = [1, 128], strides = [1, 1]} : vector<1x512xf32> to vector<1x128xf32>
    %cst_57 = arith.constant 5.000000e-01 : f32
    %109 = vector.broadcast %cst_57 : f32 to vector<1x128xf32>
    %110 = arith.mulf %109, %108 : vector<1x128xf32>
    %cst_58 = arith.constant 5.000000e-01 : f32
    %111 = vector.broadcast %cst_58 : f32 to vector<1x128xf32>
    %112 = arith.addf %110, %111 : vector<1x128xf32>
    %113 = arith.mulf %101, %88 : vector<1x128xf32>
    %114 = arith.mulf %106, %107 : vector<1x128xf32>
    %115 = arith.addf %113, %114 : vector<1x128xf32>
    %116 = math.tanh %115 : vector<1x128xf32>
    %117 = arith.mulf %112, %116 : vector<1x128xf32>
    %c4 = arith.constant 4 : index
    %c0_59 = arith.constant 0 : index
    %118 = vector.load %arg4[%c4, %c0_59] : memref<16x128xf32, #tpu.memory_space<vmem>>, vector<1x128xf32>
    tpu.vector_store %arg4[%c4, %c0_59], %117 {strides = array<i32>} : memref<16x128xf32, #tpu.memory_space<vmem>>, vector<1x128xf32>,
    %c0_60 = arith.constant 0 : index
    %c0_61 = arith.constant 0 : index
    %119 = vector.load %arg1[%c0_60, %c0_61] : memref<128x512xf32, #tpu.memory_space<vmem>>, vector<128x512xf32>
    %cst_62 = arith.constant dense<0.000000e+00> : vector<1x512xf32>
    %120 = tpu.matmul %117, %119, %cst_62 {dimension_numbers = #tpu.dot_dimension_numbers<[1], [0], [0], [1], [0, 0, 1, 1], [], []>} : vector<1x128xf32>, vector<128x512xf32>, vector<1x512xf32> -> vector<1x512xf32>
    %c4_63 = arith.constant 4 : index
    %c0_64 = arith.constant 0 : index
    %121 = vector.load %arg5[%c4_63, %c0_64] : memref<8x512xf32, #tpu.memory_space<vmem>>, vector<1x512xf32>
    %122 = arith.addf %120, %121 : vector<1x512xf32>
    %123 = math.tanh %122 : vector<1x512xf32>
    %124 = vector.extract_strided_slice %123 {offsets = [0, 0], sizes = [1, 128], strides = [1, 1]} : vector<1x512xf32> to vector<1x128xf32>
    %cst_65 = arith.constant 5.000000e-01 : f32
    %125 = vector.broadcast %cst_65 : f32 to vector<1x128xf32>
    %126 = arith.mulf %125, %124 : vector<1x128xf32>
    %cst_66 = arith.constant 5.000000e-01 : f32
    %127 = vector.broadcast %cst_66 : f32 to vector<1x128xf32>
    %128 = arith.addf %126, %127 : vector<1x128xf32>
    %129 = vector.extract_strided_slice %123 {offsets = [0, 128], sizes = [1, 128], strides = [1, 1]} : vector<1x512xf32> to vector<1x128xf32>
    %cst_67 = arith.constant 5.000000e-01 : f32
    %130 = vector.broadcast %cst_67 : f32 to vector<1x128xf32>
    %131 = arith.mulf %130, %129 : vector<1x128xf32>
    %cst_68 = arith.constant 5.000000e-01 : f32
    %132 = vector.broadcast %cst_68 : f32 to vector<1x128xf32>
    %133 = arith.addf %131, %132 : vector<1x128xf32>
    %134 = vector.extract_strided_slice %123 {offsets = [0, 256], sizes = [1, 128], strides = [1, 1]} : vector<1x512xf32> to vector<1x128xf32>
    %135 = vector.extract_strided_slice %123 {offsets = [0, 384], sizes = [1, 128], strides = [1, 1]} : vector<1x512xf32> to vector<1x128xf32>
    %cst_69 = arith.constant 5.000000e-01 : f32
    %136 = vector.broadcast %cst_69 : f32 to vector<1x128xf32>
    %137 = arith.mulf %136, %135 : vector<1x128xf32>
    %cst_70 = arith.constant 5.000000e-01 : f32
    %138 = vector.broadcast %cst_70 : f32 to vector<1x128xf32>
    %139 = arith.addf %137, %138 : vector<1x128xf32>
    %140 = arith.mulf %128, %115 : vector<1x128xf32>
    %141 = arith.mulf %133, %134 : vector<1x128xf32>
    %142 = arith.addf %140, %141 : vector<1x128xf32>
    %143 = math.tanh %142 : vector<1x128xf32>
    %144 = arith.mulf %139, %143 : vector<1x128xf32>
    %c5 = arith.constant 5 : index
    %c0_71 = arith.constant 0 : index
    %145 = vector.load %arg4[%c5, %c0_71] : memref<16x128xf32, #tpu.memory_space<vmem>>, vector<1x128xf32>
    tpu.vector_store %arg4[%c5, %c0_71], %144 {strides = array<i32>} : memref<16x128xf32, #tpu.memory_space<vmem>>, vector<1x128xf32>,
    %c0_72 = arith.constant 0 : index
    %c0_73 = arith.constant 0 : index
    %146 = vector.load %arg1[%c0_72, %c0_73] : memref<128x512xf32, #tpu.memory_space<vmem>>, vector<128x512xf32>
    %cst_74 = arith.constant dense<0.000000e+00> : vector<1x512xf32>
    %147 = tpu.matmul %144, %146, %cst_74 {dimension_numbers = #tpu.dot_dimension_numbers<[1], [0], [0], [1], [0, 0, 1, 1], [], []>} : vector<1x128xf32>, vector<128x512xf32>, vector<1x512xf32> -> vector<1x512xf32>
    %c5_75 = arith.constant 5 : index
    %c0_76 = arith.constant 0 : index
    %148 = vector.load %arg5[%c5_75, %c0_76] : memref<8x512xf32, #tpu.memory_space<vmem>>, vector<1x512xf32>
    %149 = arith.addf %147, %148 : vector<1x512xf32>
    %150 = math.tanh %149 : vector<1x512xf32>
    %151 = vector.extract_strided_slice %150 {offsets = [0, 0], sizes = [1, 128], strides = [1, 1]} : vector<1x512xf32> to vector<1x128xf32>
    %cst_77 = arith.constant 5.000000e-01 : f32
    %152 = vector.broadcast %cst_77 : f32 to vector<1x128xf32>
    %153 = arith.mulf %152, %151 : vector<1x128xf32>
    %cst_78 = arith.constant 5.000000e-01 : f32
    %154 = vector.broadcast %cst_78 : f32 to vector<1x128xf32>
    %155 = arith.addf %153, %154 : vector<1x128xf32>
    %156 = vector.extract_strided_slice %150 {offsets = [0, 128], sizes = [1, 128], strides = [1, 1]} : vector<1x512xf32> to vector<1x128xf32>
    %cst_79 = arith.constant 5.000000e-01 : f32
    %157 = vector.broadcast %cst_79 : f32 to vector<1x128xf32>
    %158 = arith.mulf %157, %156 : vector<1x128xf32>
    %cst_80 = arith.constant 5.000000e-01 : f32
    %159 = vector.broadcast %cst_80 : f32 to vector<1x128xf32>
    %160 = arith.addf %158, %159 : vector<1x128xf32>
    %161 = vector.extract_strided_slice %150 {offsets = [0, 256], sizes = [1, 128], strides = [1, 1]} : vector<1x512xf32> to vector<1x128xf32>
    %162 = vector.extract_strided_slice %150 {offsets = [0, 384], sizes = [1, 128], strides = [1, 1]} : vector<1x512xf32> to vector<1x128xf32>
    %cst_81 = arith.constant 5.000000e-01 : f32
    %163 = vector.broadcast %cst_81 : f32 to vector<1x128xf32>
    %164 = arith.mulf %163, %162 : vector<1x128xf32>
    %cst_82 = arith.constant 5.000000e-01 : f32
    %165 = vector.broadcast %cst_82 : f32 to vector<1x128xf32>
    %166 = arith.addf %164, %165 : vector<1x128xf32>
    %167 = arith.mulf %155, %142 : vector<1x128xf32>
    %168 = arith.mulf %160, %161 : vector<1x128xf32>
    %169 = arith.addf %167, %168 : vector<1x128xf32>
    %170 = math.tanh %169 : vector<1x128xf32>
    %171 = arith.mulf %166, %170 : vector<1x128xf32>
    %c6 = arith.constant 6 : index
    %c0_83 = arith.constant 0 : index
    %172 = vector.load %arg4[%c6, %c0_83] : memref<16x128xf32, #tpu.memory_space<vmem>>, vector<1x128xf32>
    tpu.vector_store %arg4[%c6, %c0_83], %171 {strides = array<i32>} : memref<16x128xf32, #tpu.memory_space<vmem>>, vector<1x128xf32>,
    %c0_84 = arith.constant 0 : index
    %c0_85 = arith.constant 0 : index
    %173 = vector.load %arg1[%c0_84, %c0_85] : memref<128x512xf32, #tpu.memory_space<vmem>>, vector<128x512xf32>
    %cst_86 = arith.constant dense<0.000000e+00> : vector<1x512xf32>
    %174 = tpu.matmul %171, %173, %cst_86 {dimension_numbers = #tpu.dot_dimension_numbers<[1], [0], [0], [1], [0, 0, 1, 1], [], []>} : vector<1x128xf32>, vector<128x512xf32>, vector<1x512xf32> -> vector<1x512xf32>
    %c6_87 = arith.constant 6 : index
    %c0_88 = arith.constant 0 : index
    %175 = vector.load %arg5[%c6_87, %c0_88] : memref<8x512xf32, #tpu.memory_space<vmem>>, vector<1x512xf32>
    %176 = arith.addf %174, %175 : vector<1x512xf32>
    %177 = math.tanh %176 : vector<1x512xf32>
    %178 = vector.extract_strided_slice %177 {offsets = [0, 0], sizes = [1, 128], strides = [1, 1]} : vector<1x512xf32> to vector<1x128xf32>
    %cst_89 = arith.constant 5.000000e-01 : f32
    %179 = vector.broadcast %cst_89 : f32 to vector<1x128xf32>
    %180 = arith.mulf %179, %178 : vector<1x128xf32>
    %cst_90 = arith.constant 5.000000e-01 : f32
    %181 = vector.broadcast %cst_90 : f32 to vector<1x128xf32>
    %182 = arith.addf %180, %181 : vector<1x128xf32>
    %183 = vector.extract_strided_slice %177 {offsets = [0, 128], sizes = [1, 128], strides = [1, 1]} : vector<1x512xf32> to vector<1x128xf32>
    %cst_91 = arith.constant 5.000000e-01 : f32
    %184 = vector.broadcast %cst_91 : f32 to vector<1x128xf32>
    %185 = arith.mulf %184, %183 : vector<1x128xf32>
    %cst_92 = arith.constant 5.000000e-01 : f32
    %186 = vector.broadcast %cst_92 : f32 to vector<1x128xf32>
    %187 = arith.addf %185, %186 : vector<1x128xf32>
    %188 = vector.extract_strided_slice %177 {offsets = [0, 256], sizes = [1, 128], strides = [1, 1]} : vector<1x512xf32> to vector<1x128xf32>
    %189 = vector.extract_strided_slice %177 {offsets = [0, 384], sizes = [1, 128], strides = [1, 1]} : vector<1x512xf32> to vector<1x128xf32>
    %cst_93 = arith.constant 5.000000e-01 : f32
    %190 = vector.broadcast %cst_93 : f32 to vector<1x128xf32>
    %191 = arith.mulf %190, %189 : vector<1x128xf32>
    %cst_94 = arith.constant 5.000000e-01 : f32
    %192 = vector.broadcast %cst_94 : f32 to vector<1x128xf32>
    %193 = arith.addf %191, %192 : vector<1x128xf32>
    %194 = arith.mulf %182, %169 : vector<1x128xf32>
    %195 = arith.mulf %187, %188 : vector<1x128xf32>
    %196 = arith.addf %194, %195 : vector<1x128xf32>
    %197 = math.tanh %196 : vector<1x128xf32>
    %198 = arith.mulf %193, %197 : vector<1x128xf32>
    %c7 = arith.constant 7 : index
    %c0_95 = arith.constant 0 : index
    %199 = vector.load %arg4[%c7, %c0_95] : memref<16x128xf32, #tpu.memory_space<vmem>>, vector<1x128xf32>
    tpu.vector_store %arg4[%c7, %c0_95], %198 {strides = array<i32>} : memref<16x128xf32, #tpu.memory_space<vmem>>, vector<1x128xf32>,
    %c0_96 = arith.constant 0 : index
    %c0_97 = arith.constant 0 : index
    %200 = vector.load %arg1[%c0_96, %c0_97] : memref<128x512xf32, #tpu.memory_space<vmem>>, vector<128x512xf32>
    %cst_98 = arith.constant dense<0.000000e+00> : vector<1x512xf32>
    %201 = tpu.matmul %198, %200, %cst_98 {dimension_numbers = #tpu.dot_dimension_numbers<[1], [0], [0], [1], [0, 0, 1, 1], [], []>} : vector<1x128xf32>, vector<128x512xf32>, vector<1x512xf32> -> vector<1x512xf32>
    %c7_99 = arith.constant 7 : index
    %c0_100 = arith.constant 0 : index
    %202 = vector.load %arg5[%c7_99, %c0_100] : memref<8x512xf32, #tpu.memory_space<vmem>>, vector<1x512xf32>
    %203 = arith.addf %201, %202 : vector<1x512xf32>
    %204 = math.tanh %203 : vector<1x512xf32>
    %205 = vector.extract_strided_slice %204 {offsets = [0, 0], sizes = [1, 128], strides = [1, 1]} : vector<1x512xf32> to vector<1x128xf32>
    %cst_101 = arith.constant 5.000000e-01 : f32
    %206 = vector.broadcast %cst_101 : f32 to vector<1x128xf32>
    %207 = arith.mulf %206, %205 : vector<1x128xf32>
    %cst_102 = arith.constant 5.000000e-01 : f32
    %208 = vector.broadcast %cst_102 : f32 to vector<1x128xf32>
    %209 = arith.addf %207, %208 : vector<1x128xf32>
    %210 = vector.extract_strided_slice %204 {offsets = [0, 128], sizes = [1, 128], strides = [1, 1]} : vector<1x512xf32> to vector<1x128xf32>
    %cst_103 = arith.constant 5.000000e-01 : f32
    %211 = vector.broadcast %cst_103 : f32 to vector<1x128xf32>
    %212 = arith.mulf %211, %210 : vector<1x128xf32>
    %cst_104 = arith.constant 5.000000e-01 : f32
    %213 = vector.broadcast %cst_104 : f32 to vector<1x128xf32>
    %214 = arith.addf %212, %213 : vector<1x128xf32>
    %215 = vector.extract_strided_slice %204 {offsets = [0, 256], sizes = [1, 128], strides = [1, 1]} : vector<1x512xf32> to vector<1x128xf32>
    %216 = vector.extract_strided_slice %204 {offsets = [0, 384], sizes = [1, 128], strides = [1, 1]} : vector<1x512xf32> to vector<1x128xf32>
    %cst_105 = arith.constant 5.000000e-01 : f32
    %217 = vector.broadcast %cst_105 : f32 to vector<1x128xf32>
    %218 = arith.mulf %217, %216 : vector<1x128xf32>
    %cst_106 = arith.constant 5.000000e-01 : f32
    %219 = vector.broadcast %cst_106 : f32 to vector<1x128xf32>
    %220 = arith.addf %218, %219 : vector<1x128xf32>
    %221 = arith.mulf %209, %196 : vector<1x128xf32>
    %222 = arith.mulf %214, %215 : vector<1x128xf32>
    %223 = arith.addf %221, %222 : vector<1x128xf32>
    %224 = math.tanh %223 : vector<1x128xf32>
    %225 = arith.mulf %220, %224 : vector<1x128xf32>
    %c8 = arith.constant 8 : index
    %c0_107 = arith.constant 0 : index
    %226 = vector.load %arg4[%c8, %c0_107] : memref<16x128xf32, #tpu.memory_space<vmem>>, vector<1x128xf32>
    tpu.vector_store %arg4[%c8, %c0_107], %225 {strides = array<i32>} : memref<16x128xf32, #tpu.memory_space<vmem>>, vector<1x128xf32>,
    return
  }
}

</mosaic_0001>

<bundles_post_ra>
// kernel: tpu_custom_call.1
= control target key start
LH: loop header
LB: loop body
LE: loop exit
PB: predicated region body
PF: predicated region fallthrough
CT: control target
= control target key end

     0   :  { %9 = vsyncpa [#allocation4], 0  ;;  %s3304_s0 = inlined_call_operand.hbm [shape: f32[8,16], index: 0, kind: input, shape index: {}]   ;;  %s3305_s1 = inlined_call_operand.hbm [shape: f32[128,512], index: 1, kind: input, shape index: {}]   ;;  %s3306_s2 = inlined_call_operand.hbm [shape: f32[16,512], index: 2, kind: input, shape index: {}]   ;;  %s3307_s3 = inlined_call_operand.vmem [shape: f32[1,512], index: 3, kind: input, shape index: {}]   ;;  %s3308_s4 = inlined_call_operand.hbm [shape: f32[16,128], index: 4, kind: output, shape index: {}]  }
   0x1   :  { %10 = vsyncpa [#allocation7], 0 }
   0x2   :  { %11 = vsyncpa [#allocation5], 0  ;;  %s2395_s15 = smov [#allocation6]  }
   0x3   :  { %s27_s16 = sshll.u32 %s2395_s15, 4  ;;  %s28_s16 = int_to_ptr.vmem [resolvable:$true] %s27_s16 }
   0x4   :  { %s2317_s17 = scalar_lea.vmem %s28_s16, 8192  ;;  %p2322_p1 = scmp.lt.s32.totalorder %s28_s16, %s28_s16 }
   0x5   :  { %p2318_p0 = scmp.ne.s32.totalorder %s28_s16, %s2317_s17  ;;  %p2323_p2 = scmp.lt.s32.totalorder %s2317_s17, %s2317_s17 }
   0x7   :  { %p2324_p3 = por %p2323_p2, %p2322_p1 }
   0x9   :  { %p2325_p4 = pnand %p2324_p3, %p2318_p0 }
   0xb   :  { %2328 = shalt.err (!%p2325_p4)
}
   0xc   :  { %s2396_s18 = smov 512   ;;  %s2397_s19 = smov 32  }
   0xd   :  { %33 = dma.hbm_to_vmem [thread:$0]  %s3305_s1, 8192, %s28_s16, [#allocation7], %s2396_s18, %s2396_s18, %s2397_s19  }
   0xe   :  { %s2398_s22 = smov [#allocation3]   ;;  %s2399_s24 = smov [#allocation8]  }
   0xf   :  { %s18_s23 = sshll.u32 %s2398_s22, 4  ;;  %s39_s25 = sshll.u32 %s2399_s24, 4  ;;  %s19_s23 = int_to_ptr.vmem [resolvable:$true] %s18_s23  ;;  %s40_s25 = int_to_ptr.vmem [resolvable:$true] %s39_s25 }
  0x10   :  { %s2337_s26 = scalar_lea.vmem %s19_s23, 128  ;;  %p2342_p6 = scmp.lt.s32.totalorder %s19_s23, %s19_s23 }
  0x11   :  { %p2338_p5 = scmp.ne.s32.totalorder %s19_s23, %s2337_s26  ;;  %p2343_p7 = scmp.lt.s32.totalorder %s2337_s26, %s2337_s26 }
  0x13   :  { %p2344_p8 = por %p2343_p7, %p2342_p6 }
  0x15   :  { %p2345_p9 = pnand %p2344_p8, %p2338_p5 }
  0x17   :  { %2348 = shalt.err (!%p2345_p9)
}
  0x18   :  { %21 = dma.hbm_to_vmem [thread:$0]  %s3304_s0, 128, %s19_s23, [#allocation4]  }
  0x19   :  { %s2357_s29 = scalar_lea.vmem %s40_s25, 1024  ;;  %p2362_p11 = scmp.lt.s32.totalorder %s40_s25, %s40_s25 }
  0x1a   :  { %p2358_p10 = scmp.ne.s32.totalorder %s40_s25, %s2357_s29  ;;  %p2363_p12 = scmp.lt.s32.totalorder %s2357_s29, %s2357_s29 }
  0x1c   :  { %p2364_p13 = por %p2363_p12, %p2362_p11 }
  0x1e   :  { %p2365_p0 = pnand %p2364_p13, %p2358_p10 }
  0x20   :  { %2368 = shalt.err (!%p2365_p0)
}
  0x21   :  { %45 = dma.hbm_to_vmem [thread:$0]  %s3306_s2, 1024, %s40_s25, [#allocation7], %s2396_s18, %s2396_s18, %s2397_s19  }
  0x22   :  { %2389 = dma.done.wait [#allocation4], 128  }
  0x23   :  { %2390 = vsyncadd [#allocation4], 4294967168 }
  0x24   :  { %2391 = dma.done.wait [#allocation7], 9216  }
  0x25   :  { %2392 = vsyncadd [#allocation7], 4294958080  ;;  %v3309_v0 = vmov 0.0   ;;  %v65_v1 = vld [vmem:[#allocation8 + $0x28] sm:$0xff]  ;;  %v67_v2 = vld [vmem:[#allocation8 + $0x38] sm:$0xff]  ;;  %vm90_vm0 = vcmask 130048  }
  0x26   :  { %158 = vmatprep.mubr.f32.mxu0 %v3309_v0  ;;  %57 = vst [vmem:[#allocation9] sm:$0xff] %v3309_v0  ;;  %58 = vst [vmem:[#allocation9 + $0x8] sm:$0xff] %v3309_v0  ;;  %229 = vmatprep.mubr.f32.mxu1 %v3309_v0  ;;  %v64_v3 = vld [vmem:[#allocation8 + $0x20] sm:$0xff]  ;;  %v66_v4 = vld [vmem:[#allocation8 + $0x30] sm:$0xff] }
  0x27   :  { %122 = vmatprep.subr.mxu0 %v65_v1  ;;  %193 = vmatprep.subr.mxu1 %v67_v2  ;;  %v61_v5 = vld [vmem:[#allocation8 + $0x8] sm:$0xff]  ;;  %v63_v6 = vld [vmem:[#allocation8 + $0x18] sm:$0xff]  ;;  %v60_v7 = vld [vmem:[#allocation8] sm:$0xff] }
  0x28   :  { %123 = vmatpush1.msra.mxu0 %v64_v3  ;;  %194 = vmatpush1.msra.mxu1 %v66_v4  ;;  %v62_v8 = vld [vmem:[#allocation8 + $0x10] sm:$0xff]  ;;  %v59_v9 = vld [vmem:[#allocation3] sm:$0xff]  ;;  %v2442_v10 = vld [vmem:[#allocation6 + $0x1e8] sm:$0xff] }
  0x29   :  { %124 = vmatprep.subr.mxu0 %v61_v5  ;;  %195 = vmatprep.subr.mxu1 %v63_v6  ;;  %3413 = vst [vmem:[#allocation13_spill] sm:$0xff] %v2442_v10  ;;  %v2444_v11 = vld [vmem:[#allocation6 + $0x1f8] sm:$0xff]  ;;  %v2446_v12 = vld [vmem:[#allocation6 + $0x1e0] sm:$0xff]  ;;  %v2448_v13 = vld [vmem:[#allocation6 + $0x1f0] sm:$0xff] }
  0x2a   :  { %3414 = vst [vmem:[#allocation14_spill] sm:$0xff] %v2444_v11  ;;  %125 = vmatpush1.msra.mxu0 %v60_v7  ;;  %196 = vmatpush1.msra.mxu1 %v62_v8  ;;  %v2450_v14 = vld [vmem:[#allocation6 + $0x1c8] sm:$0xff]  ;;  %v2452_v15 = vld [vmem:[#allocation6 + $0x1d8] sm:$0xff]  ;;  %v2456_v16 = vld [vmem:[#allocation6 + $0x1c0] sm:$0xff] }
  0x2b   :  { %2217 = vmatmul.mubr.msk.f32.vlgmr.msra.gmra.mxu0 %vm90_vm0, %v59_v9  ;;  %2218 = vmatmul.mubr.msk.f32.vlgmr.msra.gmra.mxu1 %vm90_vm0, %v59_v9  ;;  %v2458_v17 = vld [vmem:[#allocation6 + $0x1d0] sm:$0xff]  ;;  %v2462_v18 = vld [vmem:[#allocation6 + $0x1a8] sm:$0xff]  ;;  %v2464_v19 = vld [vmem:[#allocation6 + $0x1b8] sm:$0xff] }
  0x2c   :  { %326 = vmatprep.subr.mxu0 %v2442_v10  ;;  %397 = vmatprep.subr.mxu1 %v2444_v11  ;;  %v2468_v20 = vld [vmem:[#allocation6 + $0x1a0] sm:$0xff]  ;;  %v2470_v21 = vld [vmem:[#allocation6 + $0x1b0] sm:$0xff]  ;;  %v2474_v22 = vld [vmem:[#allocation6 + $0x188] sm:$0xff] }
  0x2d   :  { %327 = vmatpush1.msra.mxu0 %v2446_v12  ;;  %398 = vmatpush1.msra.mxu1 %v2448_v13  ;;  %v2476_v23 = vld [vmem:[#allocation6 + $0x198] sm:$0xff]  ;;  %v2480_v24 = vld [vmem:[#allocation6 + $0x180] sm:$0xff]  ;;  %v2482_v25 = vld [vmem:[#allocation6 + $0x190] sm:$0xff] }
  0x2e   :  { %328 = vmatprep.subr.mxu0 %v2450_v14  ;;  %399 = vmatprep.subr.mxu1 %v2452_v15  ;;  %v2486_v26 = vld [vmem:[#allocation6 + $0x168] sm:$0xff]  ;;  %v2488_v27 = vld [vmem:[#allocation6 + $0x178] sm:$0xff]  ;;  %v2492_v28 = vld [vmem:[#allocation6 + $0x160] sm:$0xff] }
  0x2f   :  { %329 = vmatpush1.msra.mxu0 %v2456_v16  ;;  %400 = vmatpush1.msra.mxu1 %v2458_v17  ;;  %v2494_v29 = vld [vmem:[#allocation6 + $0x170] sm:$0xff]  ;;  %v2498_v30 = vld [vmem:[#allocation6 + $0x148] sm:$0xff]  ;;  %v2500_v31 = vld [vmem:[#allocation6 + $0x158] sm:$0xff] }
  0x30   :  { %330 = vmatprep.subr.mxu0 %v2462_v18  ;;  %401 = vmatprep.subr.mxu1 %v2464_v19  ;;  %v2504_v32 = vld [vmem:[#allocation6 + $0x140] sm:$0xff]  ;;  %v2506_v33 = vld [vmem:[#allocation6 + $0x150] sm:$0xff]  ;;  %v2510_v34 = vld [vmem:[#allocation6 + $0x128] sm:$0xff] }
  0x31   :  { %331 = vmatpush1.msra.mxu0 %v2468_v20  ;;  %402 = vmatpush1.msra.mxu1 %v2470_v21  ;;  %v2512_v35 = vld [vmem:[#allocation6 + $0x138] sm:$0xff]  ;;  %v2516_v36 = vld [vmem:[#allocation6 + $0x120] sm:$0xff]  ;;  %v2518_v37 = vld [vmem:[#allocation6 + $0x130] sm:$0xff] }
  0x32   :  { %332 = vmatprep.subr.mxu0 %v2474_v22  ;;  %403 = vmatprep.subr.mxu1 %v2476_v23  ;;  %v2522_v38 = vld [vmem:[#allocation6 + $0x108] sm:$0xff]  ;;  %v2524_v39 = vld [vmem:[#allocation6 + $0x118] sm:$0xff]  ;;  %v2528_v40 = vld [vmem:[#allocation6 + $0x100] sm:$0xff] }
  0x33   :  { %333 = vmatpush1.msra.mxu0 %v2480_v24  ;;  %404 = vmatpush1.msra.mxu1 %v2482_v25  ;;  %v2530_v41 = vld [vmem:[#allocation6 + $0x110] sm:$0xff]  ;;  %v2534_v42 = vld [vmem:[#allocation6 + $0xe8] sm:$0xff]  ;;  %v2536_v43 = vld [vmem:[#allocation6 + $0xf8] sm:$0xff] }
  0x34   :  { %334 = vmatprep.subr.mxu0 %v2486_v26  ;;  %405 = vmatprep.subr.mxu1 %v2488_v27  ;;  %v2540_v44 = vld [vmem:[#allocation6 + $0xe0] sm:$0xff]  ;;  %v2542_v45 = vld [vmem:[#allocation6 + $0xf0] sm:$0xff]  ;;  %v2546_v46 = vld [vmem:[#allocation6 + $0xc8] sm:$0xff] }
  0x35   :  { %335 = vmatpush1.msra.mxu0 %v2492_v28  ;;  %406 = vmatpush1.msra.mxu1 %v2494_v29  ;;  %v2548_v47 = vld [vmem:[#allocation6 + $0xd8] sm:$0xff]  ;;  %v2552_v48 = vld [vmem:[#allocation6 + $0xc0] sm:$0xff]  ;;  %v2554_v49 = vld [vmem:[#allocation6 + $0xd0] sm:$0xff] }
  0x36   :  { %336 = vmatprep.subr.mxu0 %v2498_v30  ;;  %407 = vmatprep.subr.mxu1 %v2500_v31  ;;  %v2558_v50 = vld [vmem:[#allocation6 + $0xa8] sm:$0xff]  ;;  %v2560_v51 = vld [vmem:[#allocation6 + $0xb8] sm:$0xff]  ;;  %v2564_v52 = vld [vmem:[#allocation6 + $0xa0] sm:$0xff] }
  0x37   :  { %337 = vmatpush1.msra.mxu0 %v2504_v32  ;;  %408 = vmatpush1.msra.mxu1 %v2506_v33  ;;  %v2566_v53 = vld [vmem:[#allocation6 + $0xb0] sm:$0xff]  ;;  %v2570_v54 = vld [vmem:[#allocation6 + $0x88] sm:$0xff]  ;;  %v2572_v55 = vld [vmem:[#allocation6 + $0x98] sm:$0xff] }
  0x38   :  { %338 = vmatprep.subr.mxu0 %v2510_v34  ;;  %409 = vmatprep.subr.mxu1 %v2512_v35  ;;  %3415 = vst [vmem:[#allocation15_spill] sm:$0xff] %v2566_v53  ;;  %3416 = vst [vmem:[#allocation16_spill] sm:$0xff] %v2570_v54  ;;  %v2576_v56 = vld [vmem:[#allocation6 + $0x80] sm:$0xff]  ;;  %v2578_v57 = vld [vmem:[#allocation6 + $0x90] sm:$0xff] }
  0x39   :  { %339 = vmatpush1.msra.mxu0 %v2516_v36  ;;  %410 = vmatpush1.msra.mxu1 %v2518_v37  ;;  %3417 = vst [vmem:[#allocation17_spill] sm:$0xff] %v2572_v55  ;;  %3418 = vst [vmem:[#allocation18_spill] sm:$0xff] %v2576_v56  ;;  %v2582_v58 = vld [vmem:[#allocation6 + $0x68] sm:$0xff]  ;;  %v2584_v59 = vld [vmem:[#allocation6 + $0x78] sm:$0xff] }
  0x3a   :  { %340 = vmatprep.subr.mxu0 %v2522_v38  ;;  %411 = vmatprep.subr.mxu1 %v2524_v39  ;;  %3419 = vst [vmem:[#allocation19_spill] sm:$0xff] %v2578_v57  ;;  %3420 = vst [vmem:[#allocation20_spill] sm:$0xff] %v2582_v58  ;;  %v2588_v60 = vld [vmem:[#allocation6 + $0x60] sm:$0xff]  ;;  %v2590_v61 = vld [vmem:[#allocation6 + $0x70] sm:$0xff] }
  0x3b   :  { %341 = vmatpush1.msra.mxu0 %v2528_v40  ;;  %412 = vmatpush1.msra.mxu1 %v2530_v41  ;;  %3421 = vst [vmem:[#allocation21_spill] sm:$0xff] %v2584_v59  ;;  %3422 = vst [vmem:[#allocation22_spill] sm:$0xff] %v2588_v60  ;;  %v2594_v62 = vld [vmem:[#allocation6 + $0x48] sm:$0xff]  ;;  %v2596_v63 = vld [vmem:[#allocation6 + $0x58] sm:$0xff] }
  0x3c   :  { %342 = vmatprep.subr.mxu0 %v2534_v42  ;;  %413 = vmatprep.subr.mxu1 %v2536_v43  ;;  %3423 = vst [vmem:[#allocation23_spill] sm:$0xff] %v2590_v61  ;;  %3424 = vst [vmem:[#allocation24_spill] sm:$0xff] %v2594_v62  ;;  %v2600_v1 = vld [vmem:[#allocation6 + $0x40] sm:$0xff]  ;;  %v2602_v2 = vld [vmem:[#allocation6 + $0x50] sm:$0xff] }
  0x3d   :  { %343 = vmatpush1.msra.mxu0 %v2540_v44  ;;  %414 = vmatpush1.msra.mxu1 %v2542_v45  ;;  %3425 = vst [vmem:[#allocation25_spill] sm:$0xff] %v2596_v63  ;;  %3426 = vst [vmem:[#allocation26_spill] sm:$0xff] %v2600_v1  ;;  %v2606_v3 = vld [vmem:[#allocation6 + $0x28] sm:$0xff]  ;;  %v2608_v4 = vld [vmem:[#allocation6 + $0x38] sm:$0xff] }
  0x3e   :  { %344 = vmatprep.subr.mxu0 %v2546_v46  ;;  %415 = vmatprep.subr.mxu1 %v2548_v47  ;;  %3427 = vst [vmem:[#allocation27_spill] sm:$0xff] %v2602_v2  ;;  %3428 = vst [vmem:[#allocation28_spill] sm:$0xff] %v2606_v3  ;;  %v2612_v5 = vld [vmem:[#allocation6 + $0x20] sm:$0xff]  ;;  %v2614_v6 = vld [vmem:[#allocation6 + $0x30] sm:$0xff] }
  0x3f   :  { %345 = vmatpush1.msra.mxu0 %v2552_v48  ;;  %416 = vmatpush1.msra.mxu1 %v2554_v49  ;;  %3429 = vst [vmem:[#allocation29_spill] sm:$0xff] %v2608_v4  ;;  %3430 = vst [vmem:[#allocation30_spill] sm:$0xff] %v2612_v5  ;;  %v2618_v7 = vld [vmem:[#allocation6 + $0x8] sm:$0xff]  ;;  %v2620_v8 = vld [vmem:[#allocation6 + $0x18] sm:$0xff] }
  0x40   :  { %346 = vmatprep.subr.mxu0 %v2558_v50  ;;  %417 = vmatprep.subr.mxu1 %v2560_v51  ;;  %3431 = vst [vmem:[#allocation31_spill] sm:$0xff] %v2614_v6  ;;  %3432 = vst [vmem:[#allocation32_spill] sm:$0xff] %v2618_v7  ;;  %v2624_v9 = vld [vmem:[#allocation6] sm:$0xff]  ;;  %v2628_v0 = vld [vmem:[#allocation6 + $0x10] sm:$0xff] }
  0x41   :  { %347 = vmatpush1.msra.mxu0 %v2564_v52  ;;  %418 = vmatpush1.msra.mxu1 %v2566_v53  ;;  %3433 = vst [vmem:[#allocation33_spill] sm:$0xff] %v2620_v8  ;;  %3434 = vst [vmem:[#allocation34_spill] sm:$0xff] %v2624_v9 }
  0x42   :  { %348 = vmatprep.subr.mxu0 %v2570_v54  ;;  %419 = vmatprep.subr.mxu1 %v2572_v55  ;;  %3435 = vst [vmem:[#allocation35_spill] sm:$0xff] %v2628_v0 }
  0x43   :  { %349 = vmatpush1.msra.mxu0 %v2576_v56  ;;  %420 = vmatpush1.msra.mxu1 %v2578_v57 }
  0x44   :  { %350 = vmatprep.subr.mxu0 %v2582_v58  ;;  %421 = vmatprep.subr.mxu1 %v2584_v59 }
  0x45   :  { %351 = vmatpush1.msra.mxu0 %v2588_v60  ;;  %422 = vmatpush1.msra.mxu1 %v2590_v61 }
  0x46   :  { %352 = vmatprep.subr.mxu0 %v2594_v62  ;;  %423 = vmatprep.subr.mxu1 %v2596_v63 }
  0x47   :  { %353 = vmatpush1.msra.mxu0 %v2600_v1  ;;  %424 = vmatpush1.msra.mxu1 %v2602_v2  ;;  %v3436_v2 = vmov 0.0  }
  0x48   :  { %354 = vmatprep.subr.mxu0 %v2606_v3  ;;  %425 = vmatprep.subr.mxu1 %v2608_v4 }
  0x49   :  { %355 = vmatpush1.msra.mxu0 %v2612_v5  ;;  %426 = vmatpush1.msra.mxu1 %v2614_v6 }
  0x4a   :  { %356 = vmatprep.subr.mxu0 %v2618_v7  ;;  %427 = vmatprep.subr.mxu1 %v2620_v8 }
  0x4b   :  { %357 = vmatpush1.msra.mxu0 %v2624_v9  ;;  %390 = vmatprep.mubr.f32.mxu0 %v3436_v2 }
  0x4c   :  { %428 = vmatpush1.msra.mxu1 %v2628_v0  ;;  %461 = vmatprep.mubr.f32.mxu1 %v3436_v2 }
  0x4d   :  { %391 = vmatmul.mubr.f32.vlgmr.msra.gmra.mxu0 %v3436_v2  ;;  %462 = vmatmul.mubr.f32.vlgmr.msra.gmra.mxu1 %v3436_v2 }
  0x4e   :  { %571 = vmatprep.subr.mxu0 %v2442_v10  ;;  %642 = vmatprep.subr.mxu1 %v2444_v11 }
  0x4f   :  { %572 = vmatpush1.msra.mxu0 %v2446_v12  ;;  %643 = vmatpush1.msra.mxu1 %v2448_v13 }
  0x50   :  { %573 = vmatprep.subr.mxu0 %v2450_v14  ;;  %644 = vmatprep.subr.mxu1 %v2452_v15 }
  0x51   :  { %574 = vmatpush1.msra.mxu0 %v2456_v16  ;;  %645 = vmatpush1.msra.mxu1 %v2458_v17 }
  0x52   :  { %575 = vmatprep.subr.mxu0 %v2462_v18  ;;  %646 = vmatprep.subr.mxu1 %v2464_v19 }
  0x53   :  { %576 = vmatpush1.msra.mxu0 %v2468_v20  ;;  %647 = vmatpush1.msra.mxu1 %v2470_v21 }
  0x54   :  { %577 = vmatprep.subr.mxu0 %v2474_v22  ;;  %648 = vmatprep.subr.mxu1 %v2476_v23 }
  0x55   :  { %578 = vmatpush1.msra.mxu0 %v2480_v24  ;;  %649 = vmatpush1.msra.mxu1 %v2482_v25 }
  0x56   :  { %579 = vmatprep.subr.mxu0 %v2486_v26  ;;  %650 = vmatprep.subr.mxu1 %v2488_v27 }
  0x57   :  { %580 = vmatpush1.msra.mxu0 %v2492_v28  ;;  %651 = vmatpush1.msra.mxu1 %v2494_v29 }
  0x58   :  { %581 = vmatprep.subr.mxu0 %v2498_v30  ;;  %652 = vmatprep.subr.mxu1 %v2500_v31 }
  0x59   :  { %582 = vmatpush1.msra.mxu0 %v2504_v32  ;;  %653 = vmatpush1.msra.mxu1 %v2506_v33 }
  0x5a   :  { %583 = vmatprep.subr.mxu0 %v2510_v34  ;;  %654 = vmatprep.subr.mxu1 %v2512_v35 }
  0x5b   :  { %584 = vmatpush1.msra.mxu0 %v2516_v36  ;;  %655 = vmatpush1.msra.mxu1 %v2518_v37 }
  0x5c   :  { %585 = vmatprep.subr.mxu0 %v2522_v38  ;;  %656 = vmatprep.subr.mxu1 %v2524_v39 }
  0x5d   :  { %586 = vmatpush1.msra.mxu0 %v2528_v40  ;;  %657 = vmatpush1.msra.mxu1 %v2530_v41 }
  0x5e   :  { %587 = vmatprep.subr.mxu0 %v2534_v42  ;;  %658 = vmatprep.subr.mxu1 %v2536_v43 }
  0x5f   :  { %588 = vmatpush1.msra.mxu0 %v2540_v44  ;;  %659 = vmatpush1.msra.mxu1 %v2542_v45 }
  0x60   :  { %589 = vmatprep.subr.mxu0 %v2546_v46  ;;  %660 = vmatprep.subr.mxu1 %v2548_v47 }
  0x61   :  { %590 = vmatpush1.msra.mxu0 %v2552_v48  ;;  %661 = vmatpush1.msra.mxu1 %v2554_v49 }
  0x62   :  { %591 = vmatprep.subr.mxu0 %v2558_v50  ;;  %662 = vmatprep.subr.mxu1 %v2560_v51 }
  0x63   :  { %592 = vmatpush1.msra.mxu0 %v2564_v52  ;;  %663 = vmatpush1.msra.mxu1 %v2566_v53 }
  0x64   :  { %593 = vmatprep.subr.mxu0 %v2570_v54  ;;  %664 = vmatprep.subr.mxu1 %v2572_v55  ;;  %v3437_v54 = vld [vmem:[#allocation27_spill] sm:$0xff] }
  0x65   :  { %594 = vmatpush1.msra.mxu0 %v2576_v56  ;;  %665 = vmatpush1.msra.mxu1 %v2578_v57 }
  0x66   :  { %595 = vmatprep.subr.mxu0 %v2582_v58  ;;  %666 = vmatprep.subr.mxu1 %v2584_v59 }
  0x67   :  { %596 = vmatpush1.msra.mxu0 %v2588_v60  ;;  %667 = vmatpush1.msra.mxu1 %v2590_v61 }
  0x68   :  { %597 = vmatprep.subr.mxu0 %v2594_v62  ;;  %668 = vmatprep.subr.mxu1 %v2596_v63 }
  0x69   :  { %598 = vmatpush1.msra.mxu0 %v2600_v1  ;;  %669 = vmatpush1.msra.mxu1 %v3437_v54 }
  0x6a   :  { %599 = vmatprep.subr.mxu0 %v2606_v3  ;;  %670 = vmatprep.subr.mxu1 %v2608_v4  ;;  %v70_v4 = vlaneseq }
  0x6b   :  { %600 = vmatpush1.msra.mxu0 %v2612_v5  ;;  %671 = vmatpush1.msra.mxu1 %v2614_v6 }
  0x6c   :  { %601 = vmatprep.subr.mxu0 %v2618_v7  ;;  %672 = vmatprep.subr.mxu1 %v2620_v8  ;;  %v71_v5 = vshrl.u32 %v70_v4, 7 }
  0x6d   :  { %602 = vmatpush1.msra.mxu0 %v2624_v9  ;;  %635 = vmatprep.mubr.f32.mxu0 %v3436_v2  ;;  %v68_v9 = vld [vmem:[%s3307_s3] sm:$0xf]  ;;  %s2401_s3 = smov [#allocation9]  }
  0x6e   :  { %673 = vmatpush1.msra.mxu1 %v2628_v0  ;;  %706 = vmatprep.mubr.f32.mxu1 %v3436_v2  ;;  %v2706_v3 = vsub.s32 0, %v71_v5  ;;  %v2708_v6 = vsub.s32 2, %v71_v5  ;;  %v2713_v8 = vsub.s32 1, %v71_v5  ;;  %v2715_v7 = vsub.s32 3, %v71_v5  ;;  %s2204_s5 = sshll.u32 %s2401_s3, 4  ;;  %s2205_s5 = int_to_ptr.vmem [resolvable:$true] %s2204_s5 }
  0x6f   :  { %816 = vmatprep.subr.mxu0 %v2442_v10  ;;  %887 = vmatprep.subr.mxu1 %v2444_v11  ;;  %s2369_s6 = scalar_lea.vmem %s2205_s5, 256  ;;  %p2374_p2 = scmp.lt.s32.totalorder %s2205_s5, %s2205_s5 }
  0x70   :  { %3438 = vst [vmem:[#allocation36_spill] sm:$0xff] %v2706_v3  ;;  %3439 = vst [vmem:[#allocation37_spill] sm:$0xff] %v2708_v6  ;;  %v73_v0 = vrot.slane %v68_v9, %v2706_v3  ;;  %v81_v10 = vrot.slane %v68_v9, %v2708_v6  ;;  %v77_v11 = vrot.slane %v68_v9, %v2713_v8  ;;  %p2370_p1 = scmp.ne.s32.totalorder %s2205_s5, %s2369_s6  ;;  %p2375_p3 = scmp.lt.s32.totalorder %s2369_s6, %s2369_s6 }
  0x71   :  { %3440 = vst [vmem:[#allocation38_spill] sm:$0xff] %v2713_v8  ;;  %v85_v4 = vrot.slane %v68_v9, %v2715_v7 }
  0x72   :  { %p2376_p4 = por %p2375_p3, %p2374_p2 }
  0x74   :  { %p2377_p5 = pnand %p2376_p4, %p2370_p1 }
  0xeb   :  { %v160_v2 = vpop.f32.mrf.mxu0  ;;  %v231_v54 = vpop.f32.mrf.mxu1 }
  0xec   :  { %v161_v1 = vadd.f32 %v160_v2, %v73_v0  ;;  %v232_v63 = vadd.f32 %v231_v54, %v81_v10 }
  0xed   :  { %v162_v62 = vpop.f32.mrf.mxu0  ;;  %v233_v61 = vpop.f32.mrf.mxu1 }
  0xee   :  { %236 = vst [vmem:[#allocation2] sm:$0xff] %v161_v1  ;;  %238 = vst [vmem:[#allocation2 + $0x10] sm:$0xff] %v232_v63  ;;  %v163_v60 = vadd.f32 %v162_v62, %v77_v11  ;;  %v234_v59 = vadd.f32 %v233_v61, %v85_v4 }
  0xf0   :  { %237 = vst [vmem:[#allocation2 + $0x8] sm:$0xff] %v163_v60  ;;  %239 = vst [vmem:[#allocation2 + $0x18] sm:$0xff] %v234_v59 }
  0xf7   :  { %v304_v5 = vld [vmem:[#allocation2] ss:$8 sm:$0xf] }
  0xf8   :  { %v309_v58 = vrot.slane %v304_v5, %v2706_v3  ;;  %v313_v55 = vrot.slane %v304_v5, %v2713_v8  ;;  %v317_v0 = vrot.slane %v304_v5, %v2708_v6  ;;  %v321_v60 = vrot.slane %v304_v5, %v2715_v7 }
 0x10d   :  { %v392_v57 = vpop.f32.mrf.mxu0  ;;  %v463_v9 = vpop.f32.mrf.mxu1 }
 0x10e   :  { %v393_v56 = vadd.f32 %v392_v57, %v309_v58  ;;  %v464_v54 = vadd.f32 %v463_v9, %v317_v0 }
 0x10f   :  { %v394_v53 = vpop.f32.mrf.mxu0  ;;  %v465_v11 = vpop.f32.mrf.mxu1 }
 0x110   :  { %2228 = vtanh.f32 %v393_v56  ;;  %v395_v10 = vadd.f32 %v394_v53, %v313_v55  ;;  %v466_v59 = vadd.f32 %v465_v11, %v321_v60  ;;  %v3443_v11 = vld [vmem:[#allocation17_spill] sm:$0xff]  ;;  %v3444_v60 = vld [vmem:[#allocation18_spill] sm:$0xff] }
 0x112   :  { %2230 = vtanh.f32 %v395_v10  ;;  %v3441_v10 = vld [vmem:[#allocation15_spill] sm:$0xff] }
 0x113   :  { %2232 = vtanh.f32 %v464_v54  ;;  %v3442_v54 = vld [vmem:[#allocation16_spill] sm:$0xff] }
 0x114   :  { %2234 = vtanh.f32 %v466_v59  ;;  %v3445_v59 = vld [vmem:[#allocation19_spill] sm:$0xff] }
 0x11d   :  { %v2229_v61 = vpop.eup %2228 }
 0x11e   :  { %v472_v62 = vmul.f32 0.5, %v2229_v61  ;;  %v3446_v61 = vld [vmem:[#allocation20_spill] sm:$0xff] }
 0x11f   :  { %v2231_v63 = vpop.eup %2230 }
 0x120   :  { %v473_v1 = vadd.f32 0.5, %v472_v62  ;;  %v474_v57 = vmul.f32 0.5, %v2231_v63  ;;  %v2233_v2 = vpop.eup %2232  ;;  %v3447_v62 = vld [vmem:[#allocation21_spill] sm:$0xff]  ;;  %v3448_v63 = vld [vmem:[#allocation22_spill] sm:$0xff] }
 0x121   :  { %v2235_v53 = vpop.eup %2234 }
 0x122   :  { %v475_v58 = vadd.f32 0.5, %v474_v57  ;;  %v478_v4 = vmul.f32 0.0, %v473_v1  ;;  %v476_v55 = vmul.f32 0.5, %v2235_v53  ;;  %v3449_v1 = vld [vmem:[#allocation23_spill] sm:$0xff]  ;;  %v3450_v57 = vld [vmem:[#allocation24_spill] sm:$0xff]  ;;  %v3455_v53 = vld [vmem:[#allocation29_spill] sm:$0xff] }
 0x124   :  { %v479_v56 = vmul.f32 %v2233_v2, %v475_v58  ;;  %v477_v9 = vadd.f32 0.5, %v476_v55  ;;  %v3451_v58 = vld [vmem:[#allocation25_spill] sm:$0xff]  ;;  %v3452_v2 = vld [vmem:[#allocation26_spill] sm:$0xff] }
 0x125   :  { %v3456_v55 = vld [vmem:[#allocation30_spill] sm:$0xff] }
 0x126   :  { %v2725_v8 = vadd.f32 %v479_v56, %v478_v4  ;;  %v3453_v4 = vld [vmem:[#allocation27_spill] sm:$0xff]  ;;  %v3454_v56 = vld [vmem:[#allocation28_spill] sm:$0xff] }
 0x128   :  { %2236 = vtanh.f32 %v2725_v8 }
 0x135   :  { %v2237_v0 = vpop.eup %2236 }
 0x136   :  { %v482_v5 = vmul.f32 %v2237_v0, %v477_v9  ;;  %v3457_v9 = vld [vmem:[#allocation31_spill] sm:$0xff]  ;;  %v3458_v0 = vld [vmem:[#allocation32_spill] sm:$0xff] }
 0x138   :  { %483 = vst [vmem:[#allocation9 + $0x1] sm:$0x1] %v482_v5  ;;  %636 = vmatmul.mubr.f32.vlgmr.msra.gmra.mxu0 %v482_v5  ;;  %707 = vmatmul.mubr.f32.vlgmr.msra.gmra.mxu1 %v482_v5  ;;  %v3459_v5 = vld [vmem:[#allocation33_spill] sm:$0xff] }
 0x139   :  { %817 = vmatpush1.msra.mxu0 %v2446_v12  ;;  %888 = vmatpush1.msra.mxu1 %v2448_v13 }
 0x13a   :  { %818 = vmatprep.subr.mxu0 %v2450_v14  ;;  %889 = vmatprep.subr.mxu1 %v2452_v15 }
 0x13b   :  { %819 = vmatpush1.msra.mxu0 %v2456_v16  ;;  %890 = vmatpush1.msra.mxu1 %v2458_v17 }
 0x13c   :  { %820 = vmatprep.subr.mxu0 %v2462_v18  ;;  %891 = vmatprep.subr.mxu1 %v2464_v19 }
 0x13d   :  { %821 = vmatpush1.msra.mxu0 %v2468_v20  ;;  %892 = vmatpush1.msra.mxu1 %v2470_v21 }
 0x13e   :  { %822 = vmatprep.subr.mxu0 %v2474_v22  ;;  %893 = vmatprep.subr.mxu1 %v2476_v23 }
 0x13f   :  { %823 = vmatpush1.msra.mxu0 %v2480_v24  ;;  %894 = vmatpush1.msra.mxu1 %v2482_v25 }
 0x140   :  { %824 = vmatprep.subr.mxu0 %v2486_v26  ;;  %895 = vmatprep.subr.mxu1 %v2488_v27 }
 0x141   :  { %825 = vmatpush1.msra.mxu0 %v2492_v28  ;;  %896 = vmatpush1.msra.mxu1 %v2494_v29 }
 0x142   :  { %826 = vmatprep.subr.mxu0 %v2498_v30  ;;  %897 = vmatprep.subr.mxu1 %v2500_v31 }
 0x143   :  { %827 = vmatpush1.msra.mxu0 %v2504_v32  ;;  %898 = vmatpush1.msra.mxu1 %v2506_v33 }
 0x144   :  { %828 = vmatprep.subr.mxu0 %v2510_v34  ;;  %899 = vmatprep.subr.mxu1 %v2512_v35 }
 0x145   :  { %829 = vmatpush1.msra.mxu0 %v2516_v36  ;;  %900 = vmatpush1.msra.mxu1 %v2518_v37 }
 0x146   :  { %830 = vmatprep.subr.mxu0 %v2522_v38  ;;  %901 = vmatprep.subr.mxu1 %v2524_v39 }
 0x147   :  { %831 = vmatpush1.msra.mxu0 %v2528_v40  ;;  %902 = vmatpush1.msra.mxu1 %v2530_v41 }
 0x148   :  { %832 = vmatprep.subr.mxu0 %v2534_v42  ;;  %903 = vmatprep.subr.mxu1 %v2536_v43 }
 0x149   :  { %833 = vmatpush1.msra.mxu0 %v2540_v44  ;;  %904 = vmatpush1.msra.mxu1 %v2542_v45 }
 0x14a   :  { %834 = vmatprep.subr.mxu0 %v2546_v46  ;;  %905 = vmatprep.subr.mxu1 %v2548_v47 }
 0x14b   :  { %835 = vmatpush1.msra.mxu0 %v2552_v48  ;;  %906 = vmatpush1.msra.mxu1 %v2554_v49 }
 0x14c   :  { %836 = vmatprep.subr.mxu0 %v2558_v50  ;;  %907 = vmatprep.subr.mxu1 %v2560_v51 }
 0x14d   :  { %837 = vmatpush1.msra.mxu0 %v2564_v52  ;;  %908 = vmatpush1.msra.mxu1 %v3441_v10 }
 0x14e   :  { %838 = vmatprep.subr.mxu0 %v3442_v54  ;;  %909 = vmatprep.subr.mxu1 %v3443_v11 }
 0x14f   :  { %839 = vmatpush1.msra.mxu0 %v3444_v60  ;;  %910 = vmatpush1.msra.mxu1 %v3445_v59 }
 0x150   :  { %840 = vmatprep.subr.mxu0 %v3446_v61  ;;  %911 = vmatprep.subr.mxu1 %v3447_v62 }
 0x151   :  { %841 = vmatpush1.msra.mxu0 %v3448_v63  ;;  %912 = vmatpush1.msra.mxu1 %v3449_v1  ;;  %v3460_v1 = vld [vmem:[#allocation34_spill] sm:$0xff] }
 0x152   :  { %842 = vmatprep.subr.mxu0 %v3450_v57  ;;  %913 = vmatprep.subr.mxu1 %v3451_v58  ;;  %v3461_v57 = vmov 0.0   ;;  %v3462_v58 = vld [vmem:[#allocation35_spill] sm:$0xff] }
 0x153   :  { %843 = vmatpush1.msra.mxu0 %v3452_v2  ;;  %914 = vmatpush1.msra.mxu1 %v3453_v4  ;;  %v3463_v4 = vld [vmem:[#allocation13_spill] sm:$0xff] }
 0x154   :  { %844 = vmatprep.subr.mxu0 %v3454_v56  ;;  %915 = vmatprep.subr.mxu1 %v3455_v53  ;;  %v3464_v56 = vld [vmem:[#allocation14_spill] sm:$0xff] }
 0x155   :  { %845 = vmatpush1.msra.mxu0 %v3456_v55  ;;  %916 = vmatpush1.msra.mxu1 %v3457_v9  ;;  %v549_v53 = vld [vmem:[#allocation2 + $0x1] ss:$8 sm:$0xf] }
 0x156   :  { %846 = vmatprep.subr.mxu0 %v3458_v0  ;;  %917 = vmatprep.subr.mxu1 %v3459_v5  ;;  %v554_v55 = vrot.slane %v549_v53, %v2706_v3  ;;  %v3465_v0 = vld [vmem:[#allocation38_spill] sm:$0xff] }
 0x157   :  { %847 = vmatpush1.msra.mxu0 %v3460_v1  ;;  %880 = vmatprep.mubr.f32.mxu0 %v3461_v57  ;;  %v558_v63 = vrot.slane %v549_v53, %v3465_v0  ;;  %v562_v1 = vrot.slane %v549_v53, %v2708_v6 }
 0x158   :  { %918 = vmatpush1.msra.mxu1 %v3462_v58  ;;  %951 = vmatprep.mubr.f32.mxu1 %v3461_v57 }
 0x159   :  { %1061 = vmatprep.subr.mxu0 %v3463_v4  ;;  %1132 = vmatprep.subr.mxu1 %v3464_v56  ;;  %v566_v4 = vrot.slane %v549_v53, %v2715_v7 }
 0x1f8   :  { %v637_v9 = vpop.f32.mrf.mxu0  ;;  %v708_v5 = vpop.f32.mrf.mxu1 }
 0x1f9   :  { %v638_v2 = vadd.f32 %v637_v9, %v554_v55  ;;  %v709_v58 = vadd.f32 %v708_v5, %v562_v1 }
 0x1fa   :  { %v639_v62 = vpop.f32.mrf.mxu0  ;;  %v710_v57 = vpop.f32.mrf.mxu1 }
 0x1fb   :  { %2238 = vtanh.f32 %v638_v2  ;;  %v640_v61 = vadd.f32 %v639_v62, %v558_v63  ;;  %v711_v56 = vadd.f32 %v710_v57, %v566_v4  ;;  %v2876_v4 = vld [vmem:[#allocation6 + $0x1e8] sm:$0xff] }
 0x1fc   :  { %3490 = vst [vmem:[#allocation15_spill] sm:$0xff] %v2876_v4 }
 0x1fd   :  { %2240 = vtanh.f32 %v640_v61 }
 0x1fe   :  { %2242 = vtanh.f32 %v709_v58 }
 0x1ff   :  { %2244 = vtanh.f32 %v711_v56  ;;  %v2882_v56 = vld [vmem:[#allocation6 + $0x1e0] sm:$0xff] }
 0x208   :  { %v2239_v59 = vpop.eup %2238 }
 0x209   :  { %v717_v60 = vmul.f32 0.5, %v2239_v59 }
 0x20a   :  { %v2241_v3 = vpop.eup %2240 }
 0x20b   :  { %v718_v11 = vadd.f32 0.5, %v717_v60  ;;  %v719_v55 = vmul.f32 0.5, %v2241_v3  ;;  %v2243_v0 = vpop.eup %2242 }
 0x20c   :  { %v2245_v61 = vpop.eup %2244 }
 0x20d   :  { %v720_v9 = vadd.f32 0.5, %v719_v55  ;;  %v723_v2 = vmul.f32 %v718_v11, %v2725_v8  ;;  %v721_v62 = vmul.f32 0.5, %v2245_v61  ;;  %v2884_v55 = vld [vmem:[#allocation6 + $0x1f0] sm:$0xff]  ;;  %v2894_v61 = vld [vmem:[#allocation6 + $0x1c0] sm:$0xff] }
 0x20f   :  { %v724_v54 = vmul.f32 %v2243_v0, %v720_v9  ;;  %v722_v63 = vadd.f32 0.5, %v721_v62  ;;  %v2888_v9 = vld [vmem:[#allocation6 + $0x1c8] sm:$0xff]  ;;  %v2896_v62 = vld [vmem:[#allocation6 + $0x1d0] sm:$0xff] }
 0x211   :  { %v2799_v6 = vadd.f32 %v724_v54, %v723_v2  ;;  %v2890_v2 = vld [vmem:[#allocation6 + $0x1d8] sm:$0xff] }
 0x213   :  { %2246 = vtanh.f32 %v2799_v6 }
 0x220   :  { %v2247_v1 = vpop.eup %2246 }
 0x221   :  { %v727_v57 = vmul.f32 %v2247_v1, %v722_v63  ;;  %v2900_v63 = vld [vmem:[#allocation6 + $0x1a8] sm:$0xff]  ;;  %v2902_v1 = vld [vmem:[#allocation6 + $0x1b8] sm:$0xff] }
 0x223   :  { %728 = vst [vmem:[#allocation9 + $0x2] sm:$0x1] %v727_v57  ;;  %881 = vmatmul.mubr.f32.vlgmr.msra.gmra.mxu0 %v727_v57  ;;  %952 = vmatmul.mubr.f32.vlgmr.msra.gmra.mxu1 %v727_v57  ;;  %v2906_v57 = vld [vmem:[#allocation6 + $0x1a0] sm:$0xff] }
 0x224   :  { %1062 = vmatpush1.msra.mxu0 %v2446_v12  ;;  %1133 = vmatpush1.msra.mxu1 %v2448_v13  ;;  %v3466_v12 = vld [vmem:[#allocation16_spill] sm:$0xff]  ;;  %v3467_v13 = vld [vmem:[#allocation17_spill] sm:$0xff] }
 0x225   :  { %1063 = vmatprep.subr.mxu0 %v2450_v14  ;;  %1134 = vmatprep.subr.mxu1 %v2452_v15  ;;  %v3468_v14 = vld [vmem:[#allocation18_spill] sm:$0xff]  ;;  %v3469_v15 = vld [vmem:[#allocation19_spill] sm:$0xff] }
 0x226   :  { %1064 = vmatpush1.msra.mxu0 %v2456_v16  ;;  %1135 = vmatpush1.msra.mxu1 %v2458_v17  ;;  %v3470_v16 = vld [vmem:[#allocation20_spill] sm:$0xff]  ;;  %v3471_v17 = vld [vmem:[#allocation21_spill] sm:$0xff] }
 0x227   :  { %1065 = vmatprep.subr.mxu0 %v2462_v18  ;;  %1136 = vmatprep.subr.mxu1 %v2464_v19  ;;  %v3472_v18 = vld [vmem:[#allocation22_spill] sm:$0xff]  ;;  %v3473_v19 = vld [vmem:[#allocation23_spill] sm:$0xff] }
 0x228   :  { %1066 = vmatpush1.msra.mxu0 %v2468_v20  ;;  %1137 = vmatpush1.msra.mxu1 %v2470_v21  ;;  %v3474_v20 = vld [vmem:[#allocation24_spill] sm:$0xff]  ;;  %v3475_v21 = vld [vmem:[#allocation25_spill] sm:$0xff] }
 0x229   :  { %1067 = vmatprep.subr.mxu0 %v2474_v22  ;;  %1138 = vmatprep.subr.mxu1 %v2476_v23  ;;  %v3476_v22 = vld [vmem:[#allocation26_spill] sm:$0xff]  ;;  %v3477_v23 = vld [vmem:[#allocation27_spill] sm:$0xff] }
 0x22a   :  { %1068 = vmatpush1.msra.mxu0 %v2480_v24  ;;  %1139 = vmatpush1.msra.mxu1 %v2482_v25  ;;  %v3478_v24 = vld [vmem:[#allocation28_spill] sm:$0xff]  ;;  %v3479_v25 = vld [vmem:[#allocation29_spill] sm:$0xff] }
 0x22b   :  { %1069 = vmatprep.subr.mxu0 %v2486_v26  ;;  %1140 = vmatprep.subr.mxu1 %v2488_v27  ;;  %v3480_v26 = vld [vmem:[#allocation30_spill] sm:$0xff]  ;;  %v3481_v27 = vld [vmem:[#allocation31_spill] sm:$0xff] }
 0x22c   :  { %1070 = vmatpush1.msra.mxu0 %v2492_v28  ;;  %1141 = vmatpush1.msra.mxu1 %v2494_v29  ;;  %v3482_v28 = vld [vmem:[#allocation32_spill] sm:$0xff]  ;;  %v3483_v29 = vld [vmem:[#allocation33_spill] sm:$0xff] }
 0x22d   :  { %1071 = vmatprep.subr.mxu0 %v2498_v30  ;;  %1142 = vmatprep.subr.mxu1 %v2500_v31  ;;  %v3484_v30 = vld [vmem:[#allocation34_spill] sm:$0xff]  ;;  %v3485_v31 = vmov 0.0  }
 0x22e   :  { %1072 = vmatpush1.msra.mxu0 %v2504_v32  ;;  %1143 = vmatpush1.msra.mxu1 %v2506_v33  ;;  %v3486_v32 = vld [vmem:[#allocation35_spill] sm:$0xff] }
 0x22f   :  { %1073 = vmatprep.subr.mxu0 %v2510_v34  ;;  %1144 = vmatprep.subr.mxu1 %v2512_v35  ;;  %v794_v33 = vld [vmem:[#allocation2 + $0x2] ss:$8 sm:$0xf] }
 0x230   :  { %1074 = vmatpush1.msra.mxu0 %v2516_v36  ;;  %1145 = vmatpush1.msra.mxu1 %v2518_v37  ;;  %v3487_v34 = vld [vmem:[#allocation36_spill] sm:$0xff] }
 0x231   :  { %1075 = vmatprep.subr.mxu0 %v2522_v38  ;;  %1146 = vmatprep.subr.mxu1 %v2524_v39  ;;  %v799_v35 = vrot.slane %v794_v33, %v3487_v34  ;;  %v3488_v38 = vld [vmem:[#allocation38_spill] sm:$0xff] }
 0x232   :  { %1076 = vmatpush1.msra.mxu0 %v2528_v40  ;;  %1147 = vmatpush1.msra.mxu1 %v2530_v41  ;;  %v803_v39 = vrot.slane %v794_v33, %v3488_v38 }
 0x233   :  { %1077 = vmatprep.subr.mxu0 %v2534_v42  ;;  %1148 = vmatprep.subr.mxu1 %v2536_v43  ;;  %v3489_v42 = vld [vmem:[#allocation37_spill] sm:$0xff] }
 0x234   :  { %1078 = vmatpush1.msra.mxu0 %v2540_v44  ;;  %1149 = vmatpush1.msra.mxu1 %v2542_v45  ;;  %v807_v43 = vrot.slane %v794_v33, %v3489_v42 }
 0x235   :  { %1079 = vmatprep.subr.mxu0 %v2546_v46  ;;  %1150 = vmatprep.subr.mxu1 %v2548_v47  ;;  %v811_v47 = vrot.slane %v794_v33, %v2715_v7  ;;  %v2972_v33 = vld [vmem:[#allocation6 + $0xe8] sm:$0xff] }
 0x236   :  { %1080 = vmatpush1.msra.mxu0 %v2552_v48  ;;  %1151 = vmatpush1.msra.mxu1 %v2554_v49 }
 0x237   :  { %1081 = vmatprep.subr.mxu0 %v2558_v50  ;;  %1152 = vmatprep.subr.mxu1 %v2560_v51 }
 0x238   :  { %1082 = vmatpush1.msra.mxu0 %v2564_v52  ;;  %1153 = vmatpush1.msra.mxu1 %v3441_v10 }
 0x239   :  { %1083 = vmatprep.subr.mxu0 %v3466_v12  ;;  %1154 = vmatprep.subr.mxu1 %v3467_v13  ;;  %v2908_v12 = vld [vmem:[#allocation6 + $0x1b0] sm:$0xff]  ;;  %v2912_v13 = vld [vmem:[#allocation6 + $0x188] sm:$0xff] }
 0x23a   :  { %1084 = vmatpush1.msra.mxu0 %v3468_v14  ;;  %1155 = vmatpush1.msra.mxu1 %v3469_v15  ;;  %v2914_v14 = vld [vmem:[#allocation6 + $0x198] sm:$0xff]  ;;  %v2918_v15 = vld [vmem:[#allocation6 + $0x180] sm:$0xff] }
 0x23b   :  { %1085 = vmatprep.subr.mxu0 %v3470_v16  ;;  %1156 = vmatprep.subr.mxu1 %v3471_v17  ;;  %v2920_v16 = vld [vmem:[#allocation6 + $0x190] sm:$0xff]  ;;  %v2924_v17 = vld [vmem:[#allocation6 + $0x168] sm:$0xff] }
 0x23c   :  { %1086 = vmatpush1.msra.mxu0 %v3472_v18  ;;  %1157 = vmatpush1.msra.mxu1 %v3473_v19  ;;  %v2926_v18 = vld [vmem:[#allocation6 + $0x178] sm:$0xff]  ;;  %v2930_v19 = vld [vmem:[#allocation6 + $0x160] sm:$0xff] }
 0x23d   :  { %1087 = vmatprep.subr.mxu0 %v3474_v20  ;;  %1158 = vmatprep.subr.mxu1 %v3475_v21  ;;  %v2932_v20 = vld [vmem:[#allocation6 + $0x170] sm:$0xff]  ;;  %v2936_v21 = vld [vmem:[#allocation6 + $0x148] sm:$0xff] }
 0x23e   :  { %1088 = vmatpush1.msra.mxu0 %v3476_v22  ;;  %1159 = vmatpush1.msra.mxu1 %v3477_v23  ;;  %v2938_v22 = vld [vmem:[#allocation6 + $0x158] sm:$0xff]  ;;  %v2942_v23 = vld [vmem:[#allocation6 + $0x140] sm:$0xff] }
 0x23f   :  { %1089 = vmatprep.subr.mxu0 %v3478_v24  ;;  %1160 = vmatprep.subr.mxu1 %v3479_v25  ;;  %v2944_v24 = vld [vmem:[#allocation6 + $0x150] sm:$0xff]  ;;  %v2948_v25 = vld [vmem:[#allocation6 + $0x128] sm:$0xff] }
 0x240   :  { %1090 = vmatpush1.msra.mxu0 %v3480_v26  ;;  %1161 = vmatpush1.msra.mxu1 %v3481_v27  ;;  %v2950_v26 = vld [vmem:[#allocation6 + $0x138] sm:$0xff]  ;;  %v2954_v27 = vld [vmem:[#allocation6 + $0x120] sm:$0xff] }
 0x241   :  { %1091 = vmatprep.subr.mxu0 %v3482_v28  ;;  %1162 = vmatprep.subr.mxu1 %v3483_v29  ;;  %v2956_v28 = vld [vmem:[#allocation6 + $0x130] sm:$0xff]  ;;  %v2960_v29 = vld [vmem:[#allocation6 + $0x108] sm:$0xff] }
 0x242   :  { %1092 = vmatpush1.msra.mxu0 %v3484_v30  ;;  %1125 = vmatprep.mubr.f32.mxu0 %v3485_v31  ;;  %v2962_v30 = vld [vmem:[#allocation6 + $0x118] sm:$0xff] }
 0x243   :  { %1163 = vmatpush1.msra.mxu1 %v3486_v32  ;;  %1196 = vmatprep.mubr.f32.mxu1 %v3485_v31  ;;  %v2968_v32 = vld [vmem:[#allocation6 + $0x110] sm:$0xff] }
 0x244   :  { %1306 = vmatprep.subr.mxu0 %v2876_v4 }
 0x2e3   :  { %v882_v36 = vpop.f32.mrf.mxu0  ;;  %v953_v40 = vpop.f32.mrf.mxu1 }
 0x2e4   :  { %v883_v37 = vadd.f32 %v882_v36, %v799_v35  ;;  %v954_v45 = vadd.f32 %v953_v40, %v807_v43  ;;  %v2974_v35 = vld [vmem:[#allocation6 + $0xf8] sm:$0xff]  ;;  %v2978_v36 = vld [vmem:[#allocation6 + $0xe0] sm:$0xff]  ;;  %v2992_v43 = vld [vmem:[#allocation6 + $0xd0] sm:$0xff] }
 0x2e5   :  { %v884_v41 = vpop.f32.mrf.mxu0  ;;  %v955_v46 = vpop.f32.mrf.mxu1  ;;  %v2986_v40 = vld [vmem:[#allocation6 + $0xd8] sm:$0xff] }
 0x2e6   :  { %2248 = vtanh.f32 %v883_v37  ;;  %v885_v44 = vadd.f32 %v884_v41, %v803_v39  ;;  %v956_v48 = vadd.f32 %v955_v46, %v811_v47  ;;  %v2980_v37 = vld [vmem:[#allocation6 + $0xf0] sm:$0xff]  ;;  %v2984_v39 = vld [vmem:[#allocation6 + $0xc8] sm:$0xff]  ;;  %v2990_v41 = vld [vmem:[#allocation6 + $0xc0] sm:$0xff] }
 0x2e7   :  { %v3002_v46 = vld [vmem:[#allocation6 + $0xa0] sm:$0xff]  ;;  %v3004_v47 = vld [vmem:[#allocation6 + $0xb0] sm:$0xff] }
 0x2e8   :  { %2250 = vtanh.f32 %v885_v44  ;;  %v2996_v44 = vld [vmem:[#allocation6 + $0xa8] sm:$0xff] }
 0x2e9   :  { %2252 = vtanh.f32 %v954_v45  ;;  %v2998_v45 = vld [vmem:[#allocation6 + $0xb8] sm:$0xff] }
 0x2ea   :  { %2254 = vtanh.f32 %v956_v48  ;;  %v3008_v48 = vld [vmem:[#allocation6 + $0x88] sm:$0xff] }
 0x2eb   :  { %3492 = vst [vmem:[#allocation14_spill] sm:$0xff] %v3008_v48 }
 0x2f3   :  { %v2249_v49 = vpop.eup %2248 }
 0x2f4   :  { %v962_v50 = vmul.f32 0.5, %v2249_v49  ;;  %v3010_v49 = vld [vmem:[#allocation6 + $0x98] sm:$0xff] }
 0x2f5   :  { %v2251_v51 = vpop.eup %2250  ;;  %3493 = vst [vmem:[#allocation16_spill] sm:$0xff] %v3010_v49 }
 0x2f6   :  { %v963_v52 = vadd.f32 0.5, %v962_v50  ;;  %v964_v3 = vmul.f32 0.5, %v2251_v51  ;;  %v2253_v10 = vpop.eup %2252  ;;  %v3014_v50 = vld [vmem:[#allocation6 + $0x80] sm:$0xff]  ;;  %v3016_v51 = vld [vmem:[#allocation6 + $0x90] sm:$0xff] }
 0x2f7   :  { %v2255_v59 = vpop.eup %2254  ;;  %3494 = vst [vmem:[#allocation17_spill] sm:$0xff] %v3014_v50  ;;  %3495 = vst [vmem:[#allocation18_spill] sm:$0xff] %v3016_v51 }
 0x2f8   :  { %v965_v8 = vadd.f32 0.5, %v964_v3  ;;  %v968_v54 = vmul.f32 %v963_v52, %v2799_v6  ;;  %v966_v58 = vmul.f32 0.5, %v2255_v59  ;;  %v2878_v6 = vld [vmem:[#allocation6 + $0x1f8] sm:$0xff]  ;;  %v3020_v52 = vld [vmem:[#allocation6 + $0x68] sm:$0xff]  ;;  %v3038_v59 = vld [vmem:[#allocation6 + $0x40] sm:$0xff] }
 0x2f9   :  { %3491 = vst [vmem:[#allocation13_spill] sm:$0xff] %v2878_v6  ;;  %1377 = vmatprep.subr.mxu1 %v2878_v6  ;;  %3496 = vst [vmem:[#allocation19_spill] sm:$0xff] %v3020_v52  ;;  %v3022_v3 = vld [vmem:[#allocation6 + $0x78] sm:$0xff] }
 0x2fa   :  { %v969_v11 = vmul.f32 %v2253_v10, %v965_v8  ;;  %v967_v53 = vadd.f32 0.5, %v966_v58  ;;  %3497 = vst [vmem:[#allocation20_spill] sm:$0xff] %v3022_v3  ;;  %v3026_v8 = vld [vmem:[#allocation6 + $0x60] sm:$0xff]  ;;  %v3028_v10 = vld [vmem:[#allocation6 + $0x70] sm:$0xff]  ;;  %3502 = vst [vmem:[#allocation25_spill] sm:$0xff] %v3038_v59 }
 0x2fb   :  { %3498 = vst [vmem:[#allocation21_spill] sm:$0xff] %v3026_v8  ;;  %3499 = vst [vmem:[#allocation22_spill] sm:$0xff] %v3028_v10  ;;  %v3040_v58 = vld [vmem:[#allocation6 + $0x50] sm:$0xff] }
 0x2fc   :  { %v2871_v60 = vadd.f32 %v969_v11, %v968_v54  ;;  %v3032_v54 = vld [vmem:[#allocation6 + $0x48] sm:$0xff]  ;;  %v3034_v11 = vld [vmem:[#allocation6 + $0x58] sm:$0xff]  ;;  %3503 = vst [vmem:[#allocation26_spill] sm:$0xff] %v3040_v58 }
 0x2fd   :  { %3500 = vst [vmem:[#allocation23_spill] sm:$0xff] %v3032_v54  ;;  %3501 = vst [vmem:[#allocation24_spill] sm:$0xff] %v3034_v11 }
 0x2fe   :  { %2256 = vtanh.f32 %v2871_v60 }
 0x30b   :  { %v2257_v0 = vpop.eup %2256 }
 0x30c   :  { %v972_v5 = vmul.f32 %v2257_v0, %v967_v53  ;;  %v3044_v53 = vld [vmem:[#allocation6 + $0x28] sm:$0xff]  ;;  %v3046_v0 = vld [vmem:[#allocation6 + $0x38] sm:$0xff] }
 0x30d   :  { %3504 = vst [vmem:[#allocation27_spill] sm:$0xff] %v3044_v53  ;;  %3505 = vst [vmem:[#allocation28_spill] sm:$0xff] %v3046_v0 }
 0x30e   :  { %973 = vst [vmem:[#allocation9 + $0x3] sm:$0x1] %v972_v5  ;;  %1126 = vmatmul.mubr.f32.vlgmr.msra.gmra.mxu0 %v972_v5  ;;  %1197 = vmatmul.mubr.f32.vlgmr.msra.gmra.mxu1 %v972_v5  ;;  %v3050_v5 = vld [vmem:[#allocation6 + $0x20] sm:$0xff] }
 0x30f   :  { %1370 = vmatprep.mubr.f32.mxu0 %v3485_v31  ;;  %1441 = vmatprep.mubr.f32.mxu1 %v3485_v31  ;;  %v2966_v31 = vld [vmem:[#allocation6 + $0x100] sm:$0xff]  ;;  %3506 = vst [vmem:[#allocation29_spill] sm:$0xff] %v3050_v5 }
 0x310   :  { %1307 = vmatpush1.msra.mxu0 %v2882_v56  ;;  %1378 = vmatpush1.msra.mxu1 %v2884_v55 }
 0x311   :  { %1308 = vmatprep.subr.mxu0 %v2888_v9  ;;  %1379 = vmatprep.subr.mxu1 %v2890_v2 }
 0x312   :  { %1309 = vmatpush1.msra.mxu0 %v2894_v61  ;;  %1380 = vmatpush1.msra.mxu1 %v2896_v62 }
 0x313   :  { %1310 = vmatprep.subr.mxu0 %v2900_v63  ;;  %1381 = vmatprep.subr.mxu1 %v2902_v1 }
 0x314   :  { %1311 = vmatpush1.msra.mxu0 %v2906_v57  ;;  %1382 = vmatpush1.msra.mxu1 %v2908_v12 }
 0x315   :  { %1312 = vmatprep.subr.mxu0 %v2912_v13  ;;  %1383 = vmatprep.subr.mxu1 %v2914_v14 }
 0x316   :  { %1313 = vmatpush1.msra.mxu0 %v2918_v15  ;;  %1384 = vmatpush1.msra.mxu1 %v2920_v16 }
 0x317   :  { %1314 = vmatprep.subr.mxu0 %v2924_v17  ;;  %1385 = vmatprep.subr.mxu1 %v2926_v18 }
 0x318   :  { %1315 = vmatpush1.msra.mxu0 %v2930_v19  ;;  %1386 = vmatpush1.msra.mxu1 %v2932_v20 }
 0x319   :  { %1316 = vmatprep.subr.mxu0 %v2936_v21  ;;  %1387 = vmatprep.subr.mxu1 %v2938_v22 }
 0x31a   :  { %1317 = vmatpush1.msra.mxu0 %v2942_v23  ;;  %1388 = vmatpush1.msra.mxu1 %v2944_v24 }
 0x31b   :  { %1318 = vmatprep.subr.mxu0 %v2948_v25  ;;  %1389 = vmatprep.subr.mxu1 %v2950_v26 }
 0x31c   :  { %1319 = vmatpush1.msra.mxu0 %v2954_v27  ;;  %1390 = vmatpush1.msra.mxu1 %v2956_v28 }
 0x31d   :  { %1320 = vmatprep.subr.mxu0 %v2960_v29  ;;  %1391 = vmatprep.subr.mxu1 %v2962_v30 }
 0x31e   :  { %1321 = vmatpush1.msra.mxu0 %v2966_v31  ;;  %1392 = vmatpush1.msra.mxu1 %v2968_v32 }
 0x31f   :  { %1322 = vmatprep.subr.mxu0 %v2972_v33  ;;  %1393 = vmatprep.subr.mxu1 %v2974_v35 }
 0x320   :  { %1323 = vmatpush1.msra.mxu0 %v2978_v36  ;;  %1394 = vmatpush1.msra.mxu1 %v2980_v37 }
 0x321   :  { %1324 = vmatprep.subr.mxu0 %v2984_v39  ;;  %1395 = vmatprep.subr.mxu1 %v2986_v40 }
 0x322   :  { %1325 = vmatpush1.msra.mxu0 %v2990_v41  ;;  %1396 = vmatpush1.msra.mxu1 %v2992_v43 }
 0x323   :  { %1326 = vmatprep.subr.mxu0 %v2996_v44  ;;  %1397 = vmatprep.subr.mxu1 %v2998_v45 }
 0x324   :  { %1327 = vmatpush1.msra.mxu0 %v3002_v46  ;;  %1398 = vmatpush1.msra.mxu1 %v3004_v47 }
 0x325   :  { %1328 = vmatprep.subr.mxu0 %v3008_v48  ;;  %1399 = vmatprep.subr.mxu1 %v3010_v49 }
 0x326   :  { %1329 = vmatpush1.msra.mxu0 %v3014_v50  ;;  %1400 = vmatpush1.msra.mxu1 %v3016_v51 }
 0x327   :  { %1330 = vmatprep.subr.mxu0 %v3020_v52  ;;  %1401 = vmatprep.subr.mxu1 %v3022_v3 }
 0x328   :  { %1331 = vmatpush1.msra.mxu0 %v3026_v8  ;;  %1402 = vmatpush1.msra.mxu1 %v3028_v10 }
 0x329   :  { %1332 = vmatprep.subr.mxu0 %v3032_v54  ;;  %1403 = vmatprep.subr.mxu1 %v3034_v11  ;;  %v3052_v54 = vld [vmem:[#allocation6 + $0x30] sm:$0xff]  ;;  %v3056_v11 = vld [vmem:[#allocation6 + $0x8] sm:$0xff] }
 0x32a   :  { %1333 = vmatpush1.msra.mxu0 %v3038_v59  ;;  %1404 = vmatpush1.msra.mxu1 %v3040_v58  ;;  %3507 = vst [vmem:[#allocation30_spill] sm:$0xff] %v3052_v54  ;;  %3508 = vst [vmem:[#allocation31_spill] sm:$0xff] %v3056_v11  ;;  %v3058_v59 = vld [vmem:[#allocation6 + $0x18] sm:$0xff]  ;;  %v3062_v58 = vld [vmem:[#allocation6] sm:$0xff] }
 0x32b   :  { %1334 = vmatprep.subr.mxu0 %v3044_v53  ;;  %1405 = vmatprep.subr.mxu1 %v3046_v0  ;;  %3509 = vst [vmem:[#allocation32_spill] sm:$0xff] %v3058_v59  ;;  %3510 = vst [vmem:[#allocation33_spill] sm:$0xff] %v3062_v58  ;;  %v3064_v53 = vld [vmem:[#allocation6 + $0x10] sm:$0xff] }
 0x32c   :  { %1335 = vmatpush1.msra.mxu0 %v3050_v5  ;;  %1406 = vmatpush1.msra.mxu1 %v3052_v54  ;;  %3511 = vst [vmem:[#allocation34_spill] sm:$0xff] %v3064_v53  ;;  %v1039_v54 = vld [vmem:[#allocation2 + $0x3] ss:$8 sm:$0xf] }
 0x32d   :  { %1336 = vmatprep.subr.mxu0 %v3056_v11  ;;  %1407 = vmatprep.subr.mxu1 %v3058_v59  ;;  %v1044_v5 = vrot.slane %v1039_v54, %v3487_v34  ;;  %v1048_v11 = vrot.slane %v1039_v54, %v3488_v38  ;;  %v1052_v3 = vrot.slane %v1039_v54, %v3489_v42 }
 0x32e   :  { %1337 = vmatpush1.msra.mxu0 %v3062_v58  ;;  %1408 = vmatpush1.msra.mxu1 %v3064_v53 }
 0x32f   :  { %1551 = vmatprep.subr.mxu0 %v2876_v4  ;;  %1622 = vmatprep.subr.mxu1 %v2878_v6  ;;  %v1056_v4 = vrot.slane %v1039_v54, %v2715_v7 }
 0x3ce   :  { %v1127_v0 = vpop.f32.mrf.mxu0  ;;  %v1198_v59 = vpop.f32.mrf.mxu1 }
 0x3cf   :  { %v1128_v10 = vadd.f32 %v1127_v0, %v1044_v5  ;;  %v1199_v58 = vadd.f32 %v1198_v59, %v1052_v3  ;;  %v3521_v59 = vld [vmem:[#allocation24_spill] sm:$0xff] }
 0x3d0   :  { %v1129_v8 = vpop.f32.mrf.mxu0  ;;  %v1200_v53 = vpop.f32.mrf.mxu1 }
 0x3d1   :  { %2258 = vtanh.f32 %v1128_v10  ;;  %v1130_v52 = vadd.f32 %v1129_v8, %v1048_v11  ;;  %v1201_v6 = vadd.f32 %v1200_v53, %v1056_v4  ;;  %v3520_v11 = vld [vmem:[#allocation23_spill] sm:$0xff]  ;;  %v3523_v53 = vld [vmem:[#allocation26_spill] sm:$0xff] }
 0x3d3   :  { %2260 = vtanh.f32 %v1130_v52 }
 0x3d4   :  { %2262 = vtanh.f32 %v1199_v58  ;;  %v3522_v58 = vld [vmem:[#allocation25_spill] sm:$0xff] }
 0x3d5   :  { %2264 = vtanh.f32 %v1201_v6  ;;  %v3515_v6 = vld [vmem:[#allocation18_spill] sm:$0xff] }
 0x3de   :  { %v2259_v51 = vpop.eup %2258 }
 0x3df   :  { %v1207_v50 = vmul.f32 0.5, %v2259_v51  ;;  %v3519_v51 = vld [vmem:[#allocation22_spill] sm:$0xff] }
 0x3e0   :  { %v2261_v34 = vpop.eup %2260 }
 0x3e1   :  { %v1208_v49 = vadd.f32 0.5, %v1207_v50  ;;  %v1209_v0 = vmul.f32 0.5, %v2261_v34  ;;  %v2263_v38 = vpop.eup %2262  ;;  %v3512_v34 = vld [vmem:[#allocation14_spill] sm:$0xff]  ;;  %v3518_v50 = vld [vmem:[#allocation21_spill] sm:$0xff] }
 0x3e2   :  { %v2265_v52 = vpop.eup %2264 }
 0x3e3   :  { %v1210_v5 = vadd.f32 0.5, %v1209_v0  ;;  %v1213_v10 = vmul.f32 %v1208_v49, %v2871_v60  ;;  %v1211_v3 = vmul.f32 0.5, %v2265_v52  ;;  %v3514_v60 = vld [vmem:[#allocation17_spill] sm:$0xff]  ;;  %v3517_v49 = vld [vmem:[#allocation20_spill] sm:$0xff]  ;;  %v3524_v0 = vld [vmem:[#allocation27_spill] sm:$0xff] }
 0x3e4   :  { %v3527_v52 = vld [vmem:[#allocation30_spill] sm:$0xff] }
 0x3e5   :  { %v1214_v48 = vmul.f32 %v2263_v38, %v1210_v5  ;;  %v1212_v8 = vadd.f32 0.5, %v1211_v3  ;;  %v3513_v38 = vld [vmem:[#allocation16_spill] sm:$0xff]  ;;  %v3528_v3 = vld [vmem:[#allocation31_spill] sm:$0xff] }
 0x3e6   :  { %v3525_v5 = vld [vmem:[#allocation28_spill] sm:$0xff] }
 0x3e7   :  { %v3075_v42 = vadd.f32 %v1214_v48, %v1213_v10  ;;  %v3516_v48 = vld [vmem:[#allocation19_spill] sm:$0xff]  ;;  %v3526_v10 = vld [vmem:[#allocation29_spill] sm:$0xff] }
 0x3e9   :  { %2266 = vtanh.f32 %v3075_v42 }
 0x3f6   :  { %v2267_v54 = vpop.eup %2266 }
 0x3f7   :  { %v1217_v4 = vmul.f32 %v2267_v54, %v1212_v8  ;;  %v3529_v8 = vld [vmem:[#allocation32_spill] sm:$0xff]  ;;  %v3530_v54 = vld [vmem:[#allocation33_spill] sm:$0xff] }
 0x3f9   :  { %1218 = vst [vmem:[#allocation9 + $0x4] sm:$0x1] %v1217_v4  ;;  %1371 = vmatmul.mubr.f32.vlgmr.msra.gmra.mxu0 %v1217_v4  ;;  %1442 = vmatmul.mubr.f32.vlgmr.msra.gmra.mxu1 %v1217_v4  ;;  %v3139_v4 = vld [vmem:[#allocation9 + $0x8] sm:$0xff] }
 0x3fa   :  { %1552 = vmatpush1.msra.mxu0 %v2882_v56  ;;  %1623 = vmatpush1.msra.mxu1 %v2884_v55  ;;  %3531 = vst [vmem:[#allocation35_spill] sm:$0xff] %v3139_v4 }
 0x3fb   :  { %1553 = vmatprep.subr.mxu0 %v2888_v9  ;;  %1624 = vmatprep.subr.mxu1 %v2890_v2 }
 0x3fc   :  { %1554 = vmatpush1.msra.mxu0 %v2894_v61  ;;  %1625 = vmatpush1.msra.mxu1 %v2896_v62 }
 0x3fd   :  { %1555 = vmatprep.subr.mxu0 %v2900_v63  ;;  %1626 = vmatprep.subr.mxu1 %v2902_v1 }
 0x3fe   :  { %1556 = vmatpush1.msra.mxu0 %v2906_v57  ;;  %1627 = vmatpush1.msra.mxu1 %v2908_v12 }
 0x3ff   :  { %1557 = vmatprep.subr.mxu0 %v2912_v13  ;;  %1628 = vmatprep.subr.mxu1 %v2914_v14 }
 0x400   :  { %1558 = vmatpush1.msra.mxu0 %v2918_v15  ;;  %1629 = vmatpush1.msra.mxu1 %v2920_v16 }
 0x401   :  { %1559 = vmatprep.subr.mxu0 %v2924_v17  ;;  %1630 = vmatprep.subr.mxu1 %v2926_v18 }
 0x402   :  { %1560 = vmatpush1.msra.mxu0 %v2930_v19  ;;  %1631 = vmatpush1.msra.mxu1 %v2932_v20 }
 0x403   :  { %1561 = vmatprep.subr.mxu0 %v2936_v21  ;;  %1632 = vmatprep.subr.mxu1 %v2938_v22 }
 0x404   :  { %1562 = vmatpush1.msra.mxu0 %v2942_v23  ;;  %1633 = vmatpush1.msra.mxu1 %v2944_v24 }
 0x405   :  { %1563 = vmatprep.subr.mxu0 %v2948_v25  ;;  %1634 = vmatprep.subr.mxu1 %v2950_v26 }
 0x406   :  { %1564 = vmatpush1.msra.mxu0 %v2954_v27  ;;  %1635 = vmatpush1.msra.mxu1 %v2956_v28 }
 0x407   :  { %1565 = vmatprep.subr.mxu0 %v2960_v29  ;;  %1636 = vmatprep.subr.mxu1 %v2962_v30 }
 0x408   :  { %1566 = vmatpush1.msra.mxu0 %v2966_v31  ;;  %1637 = vmatpush1.msra.mxu1 %v2968_v32 }
 0x409   :  { %1567 = vmatprep.subr.mxu0 %v2972_v33  ;;  %1638 = vmatprep.subr.mxu1 %v2974_v35 }
 0x40a   :  { %1568 = vmatpush1.msra.mxu0 %v2978_v36  ;;  %1639 = vmatpush1.msra.mxu1 %v2980_v37 }
 0x40b   :  { %1569 = vmatprep.subr.mxu0 %v2984_v39  ;;  %1640 = vmatprep.subr.mxu1 %v2986_v40 }
 0x40c   :  { %1570 = vmatpush1.msra.mxu0 %v2990_v41  ;;  %1641 = vmatpush1.msra.mxu1 %v2992_v43 }
 0x40d   :  { %1571 = vmatprep.subr.mxu0 %v2996_v44  ;;  %1642 = vmatprep.subr.mxu1 %v2998_v45 }
 0x40e   :  { %1572 = vmatpush1.msra.mxu0 %v3002_v46  ;;  %1643 = vmatpush1.msra.mxu1 %v3004_v47 }
 0x40f   :  { %1573 = vmatprep.subr.mxu0 %v3512_v34  ;;  %1644 = vmatprep.subr.mxu1 %v3513_v38 }
 0x410   :  { %1574 = vmatpush1.msra.mxu0 %v3514_v60  ;;  %1645 = vmatpush1.msra.mxu1 %v3515_v6 }
 0x411   :  { %1575 = vmatprep.subr.mxu0 %v3516_v48  ;;  %1646 = vmatprep.subr.mxu1 %v3517_v49 }
 0x412   :  { %1576 = vmatpush1.msra.mxu0 %v3518_v50  ;;  %1647 = vmatpush1.msra.mxu1 %v3519_v51  ;;  %v3537_v50 = vld [vmem:[#allocation37_spill] sm:$0xff] }
 0x413   :  { %1577 = vmatprep.subr.mxu0 %v3520_v11  ;;  %1648 = vmatprep.subr.mxu1 %v3521_v59 }
 0x414   :  { %1578 = vmatpush1.msra.mxu0 %v3522_v58  ;;  %1649 = vmatpush1.msra.mxu1 %v3523_v53  ;;  %v3532_v58 = vld [vmem:[#allocation34_spill] sm:$0xff] }
 0x415   :  { %1579 = vmatprep.subr.mxu0 %v3524_v0  ;;  %1650 = vmatprep.subr.mxu1 %v3525_v5  ;;  %v3533_v0 = vld [vmem:[#allocation15_spill] sm:$0xff]  ;;  %v3534_v5 = vld [vmem:[#allocation13_spill] sm:$0xff] }
 0x416   :  { %1580 = vmatpush1.msra.mxu0 %v3526_v10  ;;  %1651 = vmatpush1.msra.mxu1 %v3527_v52  ;;  %v1284_v10 = vld [vmem:[#allocation2 + $0x4] ss:$8 sm:$0xf] }
 0x417   :  { %1581 = vmatprep.subr.mxu0 %v3528_v3  ;;  %1652 = vmatprep.subr.mxu1 %v3529_v8  ;;  %v3535_v52 = vld [vmem:[#allocation36_spill] sm:$0xff]  ;;  %v3536_v8 = vld [vmem:[#allocation38_spill] sm:$0xff]  ;;  %v1297_v49 = vrot.slane %v1284_v10, %v3537_v50 }
 0x418   :  { %1582 = vmatpush1.msra.mxu0 %v3530_v54  ;;  %1615 = vmatprep.mubr.f32.mxu0 %v3139_v4  ;;  %v1289_v53 = vrot.slane %v1284_v10, %v3535_v52  ;;  %v1293_v11 = vrot.slane %v1284_v10, %v3536_v8 }
 0x419   :  { %1653 = vmatpush1.msra.mxu1 %v3532_v58  ;;  %1686 = vmatprep.mubr.f32.mxu1 %v3139_v4 }
 0x41a   :  { %1796 = vmatprep.subr.mxu0 %v3533_v0  ;;  %1867 = vmatprep.subr.mxu1 %v3534_v5  ;;  %v1301_v0 = vrot.slane %v1284_v10, %v2715_v7  ;;  %v3545_v10 = vld [vmem:[#allocation22_spill] sm:$0xff] }
 0x4b9   :  { %v1372_v3 = vpop.f32.mrf.mxu0  ;;  %v1443_v54 = vpop.f32.mrf.mxu1 }
 0x4ba   :  { %v1373_v59 = vadd.f32 %v1372_v3, %v1289_v53  ;;  %v1444_v58 = vadd.f32 %v1443_v54, %v1297_v49  ;;  %v3548_v54 = vld [vmem:[#allocation25_spill] sm:$0xff] }
 0x4bb   :  { %v1374_v51 = vpop.f32.mrf.mxu0  ;;  %v1445_v4 = vpop.f32.mrf.mxu1 }
 0x4bc   :  { %2268 = vtanh.f32 %v1373_v59  ;;  %v1375_v48 = vadd.f32 %v1374_v51, %v1293_v11  ;;  %v1446_v5 = vadd.f32 %v1445_v4, %v1301_v0  ;;  %v3543_v0 = vld [vmem:[#allocation20_spill] sm:$0xff]  ;;  %v3549_v4 = vld [vmem:[#allocation26_spill] sm:$0xff] }
 0x4be   :  { %2270 = vtanh.f32 %v1375_v48 }
 0x4bf   :  { %2272 = vtanh.f32 %v1444_v58 }
 0x4c0   :  { %2274 = vtanh.f32 %v1446_v5  ;;  %v3544_v5 = vld [vmem:[#allocation21_spill] sm:$0xff] }
 0x4c9   :  { %v2269_v6 = vpop.eup %2268 }
 0x4ca   :  { %v1452_v60 = vmul.f32 0.5, %v2269_v6  ;;  %v3542_v6 = vld [vmem:[#allocation19_spill] sm:$0xff] }
 0x4cb   :  { %v2271_v52 = vpop.eup %2270 }
 0x4cc   :  { %v1453_v38 = vadd.f32 0.5, %v1452_v60  ;;  %v1454_v53 = vmul.f32 0.5, %v2271_v52  ;;  %v2273_v8 = vpop.eup %2272  ;;  %v3541_v60 = vld [vmem:[#allocation18_spill] sm:$0xff]  ;;  %v3546_v52 = vld [vmem:[#allocation23_spill] sm:$0xff] }
 0x4cd   :  { %v2275_v48 = vpop.eup %2274 }
 0x4ce   :  { %v1455_v3 = vadd.f32 0.5, %v1454_v53  ;;  %v1458_v59 = vmul.f32 %v1453_v38, %v3075_v42  ;;  %v1456_v49 = vmul.f32 0.5, %v2275_v48  ;;  %v3538_v42 = vld [vmem:[#allocation14_spill] sm:$0xff]  ;;  %v3540_v38 = vld [vmem:[#allocation17_spill] sm:$0xff]  ;;  %v3550_v53 = vld [vmem:[#allocation27_spill] sm:$0xff] }
 0x4cf   :  { %v3553_v48 = vld [vmem:[#allocation30_spill] sm:$0xff] }
 0x4d0   :  { %v1459_v34 = vmul.f32 %v2273_v8, %v1455_v3  ;;  %v1457_v51 = vadd.f32 0.5, %v1456_v49  ;;  %v3547_v8 = vld [vmem:[#allocation24_spill] sm:$0xff]  ;;  %v3554_v49 = vld [vmem:[#allocation31_spill] sm:$0xff] }
 0x4d1   :  { %v3551_v3 = vld [vmem:[#allocation28_spill] sm:$0xff] }
 0x4d2   :  { %v3151_v50 = vadd.f32 %v1459_v34, %v1458_v59  ;;  %v3539_v34 = vld [vmem:[#allocation16_spill] sm:$0xff]  ;;  %v3552_v59 = vld [vmem:[#allocation29_spill] sm:$0xff] }
 0x4d4   :  { %2276 = vtanh.f32 %v3151_v50 }
 0x4e1   :  { %v2277_v11 = vpop.eup %2276 }
 0x4e2   :  { %v1462_v58 = vmul.f32 %v2277_v11, %v1457_v51  ;;  %v3555_v51 = vld [vmem:[#allocation32_spill] sm:$0xff]  ;;  %v3556_v11 = vld [vmem:[#allocation33_spill] sm:$0xff] }
 0x4e4   :  { %1463 = vst [vmem:[#allocation9 + $0x5] sm:$0x1] %v1462_v58  ;;  %1616 = vmatmul.mubr.f32.vlgmr.msra.gmra.mxu0 %v1462_v58  ;;  %1687 = vmatmul.mubr.f32.vlgmr.msra.gmra.mxu1 %v1462_v58  ;;  %v3557_v58 = vld [vmem:[#allocation35_spill] sm:$0xff] }
 0x4e5   :  { %1797 = vmatpush1.msra.mxu0 %v2882_v56  ;;  %1868 = vmatpush1.msra.mxu1 %v2884_v55 }
 0x4e6   :  { %1798 = vmatprep.subr.mxu0 %v2888_v9  ;;  %1869 = vmatprep.subr.mxu1 %v2890_v2 }
 0x4e7   :  { %1799 = vmatpush1.msra.mxu0 %v2894_v61  ;;  %1870 = vmatpush1.msra.mxu1 %v2896_v62 }
 0x4e8   :  { %1800 = vmatprep.subr.mxu0 %v2900_v63  ;;  %1871 = vmatprep.subr.mxu1 %v2902_v1 }
 0x4e9   :  { %1801 = vmatpush1.msra.mxu0 %v2906_v57  ;;  %1872 = vmatpush1.msra.mxu1 %v2908_v12 }
 0x4ea   :  { %1802 = vmatprep.subr.mxu0 %v2912_v13  ;;  %1873 = vmatprep.subr.mxu1 %v2914_v14 }
 0x4eb   :  { %1803 = vmatpush1.msra.mxu0 %v2918_v15  ;;  %1874 = vmatpush1.msra.mxu1 %v2920_v16 }
 0x4ec   :  { %1804 = vmatprep.subr.mxu0 %v2924_v17  ;;  %1875 = vmatprep.subr.mxu1 %v2926_v18 }
 0x4ed   :  { %1805 = vmatpush1.msra.mxu0 %v2930_v19  ;;  %1876 = vmatpush1.msra.mxu1 %v2932_v20 }
 0x4ee   :  { %1806 = vmatprep.subr.mxu0 %v2936_v21  ;;  %1877 = vmatprep.subr.mxu1 %v2938_v22 }
 0x4ef   :  { %1807 = vmatpush1.msra.mxu0 %v2942_v23  ;;  %1878 = vmatpush1.msra.mxu1 %v2944_v24 }
 0x4f0   :  { %1808 = vmatprep.subr.mxu0 %v2948_v25  ;;  %1879 = vmatprep.subr.mxu1 %v2950_v26 }
 0x4f1   :  { %1809 = vmatpush1.msra.mxu0 %v2954_v27  ;;  %1880 = vmatpush1.msra.mxu1 %v2956_v28 }
 0x4f2   :  { %1810 = vmatprep.subr.mxu0 %v2960_v29  ;;  %1881 = vmatprep.subr.mxu1 %v2962_v30 }
 0x4f3   :  { %1811 = vmatpush1.msra.mxu0 %v2966_v31  ;;  %1882 = vmatpush1.msra.mxu1 %v2968_v32 }
 0x4f4   :  { %1812 = vmatprep.subr.mxu0 %v2972_v33  ;;  %1883 = vmatprep.subr.mxu1 %v2974_v35 }
 0x4f5   :  { %1813 = vmatpush1.msra.mxu0 %v2978_v36  ;;  %1884 = vmatpush1.msra.mxu1 %v2980_v37 }
 0x4f6   :  { %1814 = vmatprep.subr.mxu0 %v2984_v39  ;;  %1885 = vmatprep.subr.mxu1 %v2986_v40 }
 0x4f7   :  { %1815 = vmatpush1.msra.mxu0 %v2990_v41  ;;  %1886 = vmatpush1.msra.mxu1 %v2992_v43 }
 0x4f8   :  { %1816 = vmatprep.subr.mxu0 %v2996_v44  ;;  %1887 = vmatprep.subr.mxu1 %v2998_v45 }
 0x4f9   :  { %1817 = vmatpush1.msra.mxu0 %v3002_v46  ;;  %1888 = vmatpush1.msra.mxu1 %v3004_v47 }
 0x4fa   :  { %1818 = vmatprep.subr.mxu0 %v3538_v42  ;;  %1889 = vmatprep.subr.mxu1 %v3539_v34 }
 0x4fb   :  { %1819 = vmatpush1.msra.mxu0 %v3540_v38  ;;  %1890 = vmatpush1.msra.mxu1 %v3541_v60 }
 0x4fc   :  { %1820 = vmatprep.subr.mxu0 %v3542_v6  ;;  %1891 = vmatprep.subr.mxu1 %v3543_v0 }
 0x4fd   :  { %1821 = vmatpush1.msra.mxu0 %v3544_v5  ;;  %1892 = vmatpush1.msra.mxu1 %v3545_v10 }
 0x4fe   :  { %1822 = vmatprep.subr.mxu0 %v3546_v52  ;;  %1893 = vmatprep.subr.mxu1 %v3547_v8  ;;  %v3558_v8 = vld [vmem:[#allocation34_spill] sm:$0xff] }
 0x4ff   :  { %1823 = vmatpush1.msra.mxu0 %v3548_v54  ;;  %1894 = vmatpush1.msra.mxu1 %v3549_v4  ;;  %v3559_v4 = vld [vmem:[#allocation15_spill] sm:$0xff] }
 0x500   :  { %1824 = vmatprep.subr.mxu0 %v3550_v53  ;;  %1895 = vmatprep.subr.mxu1 %v3551_v3  ;;  %v3560_v53 = vld [vmem:[#allocation13_spill] sm:$0xff] }
 0x501   :  { %1825 = vmatpush1.msra.mxu0 %v3552_v59  ;;  %1896 = vmatpush1.msra.mxu1 %v3553_v48  ;;  %v1529_v3 = vld [vmem:[#allocation2 + $0x5] ss:$8 sm:$0xf] }
 0x502   :  { %1826 = vmatprep.subr.mxu0 %v3554_v49  ;;  %1897 = vmatprep.subr.mxu1 %v3555_v51  ;;  %v3561_v59 = vld [vmem:[#allocation36_spill] sm:$0xff]  ;;  %v3562_v49 = vld [vmem:[#allocation38_spill] sm:$0xff] }
 0x503   :  { %1827 = vmatpush1.msra.mxu0 %v3556_v11  ;;  %1860 = vmatprep.mubr.f32.mxu0 %v3557_v58  ;;  %v1534_v54 = vrot.slane %v1529_v3, %v3561_v59  ;;  %v1538_v10 = vrot.slane %v1529_v3, %v3562_v49  ;;  %v3563_v11 = vld [vmem:[#allocation37_spill] sm:$0xff] }
 0x504   :  { %1898 = vmatpush1.msra.mxu1 %v3558_v8  ;;  %1931 = vmatprep.mubr.f32.mxu1 %v3557_v58  ;;  %v1542_v0 = vrot.slane %v1529_v3, %v3563_v11 }
 0x505   :  { %2041 = vmatprep.subr.mxu0 %v3559_v4  ;;  %2112 = vmatprep.subr.mxu1 %v3560_v53  ;;  %v1546_v4 = vrot.slane %v1529_v3, %v2715_v7 }
 0x5a4   :  { %v1617_v48 = vpop.f32.mrf.mxu0  ;;  %v1688_v51 = vpop.f32.mrf.mxu1 }
 0x5a5   :  { %v1618_v52 = vadd.f32 %v1617_v48, %v1534_v54  ;;  %v1689_v8 = vadd.f32 %v1688_v51, %v1542_v0 }
 0x5a6   :  { %v1619_v5 = vpop.f32.mrf.mxu0  ;;  %v1690_v58 = vpop.f32.mrf.mxu1 }
 0x5a7   :  { %2278 = vtanh.f32 %v1618_v52  ;;  %v1620_v6 = vadd.f32 %v1619_v5, %v1538_v10  ;;  %v1691_v53 = vadd.f32 %v1690_v58, %v1546_v4  ;;  %v2019_v4 = vld [vmem:[#allocation2 + $0x7] ss:$8 sm:$0xf] }
 0x5a9   :  { %2280 = vtanh.f32 %v1620_v6 }
 0x5aa   :  { %2282 = vtanh.f32 %v1689_v8 }
 0x5ab   :  { %2284 = vtanh.f32 %v1691_v53 }
 0x5b4   :  { %v2279_v60 = vpop.eup %2278 }
 0x5b5   :  { %v1697_v38 = vmul.f32 0.5, %v2279_v60 }
 0x5b6   :  { %v2281_v59 = vpop.eup %2280 }
 0x5b7   :  { %v1698_v34 = vadd.f32 0.5, %v1697_v38  ;;  %v1699_v54 = vmul.f32 0.5, %v2281_v59  ;;  %v2283_v49 = vpop.eup %2282 }
 0x5b8   :  { %v2285_v6 = vpop.eup %2284 }
 0x5b9   :  { %v1700_v48 = vadd.f32 0.5, %v1699_v54  ;;  %v1703_v52 = vmul.f32 %v1698_v34, %v3151_v50  ;;  %v1701_v0 = vmul.f32 0.5, %v2285_v6 }
 0x5bb   :  { %v1704_v42 = vmul.f32 %v2283_v49, %v1700_v48  ;;  %v1702_v5 = vadd.f32 0.5, %v1701_v0 }
 0x5bd   :  { %v3225_v11 = vadd.f32 %v1704_v42, %v1703_v52 }
 0x5bf   :  { %2286 = vtanh.f32 %v3225_v11 }
 0x5cc   :  { %v2287_v10 = vpop.eup %2286 }
 0x5cd   :  { %v1707_v8 = vmul.f32 %v2287_v10, %v1702_v5 }
 0x5cf   :  { %1708 = vst [vmem:[#allocation9 + $0x6] sm:$0x1] %v1707_v8  ;;  %1861 = vmatmul.mubr.f32.vlgmr.msra.gmra.mxu0 %v1707_v8  ;;  %1932 = vmatmul.mubr.f32.vlgmr.msra.gmra.mxu1 %v1707_v8 }
 0x5d0   :  { %2042 = vmatpush1.msra.mxu0 %v2882_v56  ;;  %2113 = vmatpush1.msra.mxu1 %v2884_v55  ;;  %v3564_v56 = vld [vmem:[#allocation14_spill] sm:$0xff]  ;;  %v3565_v55 = vld [vmem:[#allocation16_spill] sm:$0xff] }
 0x5d1   :  { %2043 = vmatprep.subr.mxu0 %v2888_v9  ;;  %2114 = vmatprep.subr.mxu1 %v2890_v2  ;;  %v3566_v9 = vld [vmem:[#allocation17_spill] sm:$0xff]  ;;  %v3567_v2 = vld [vmem:[#allocation18_spill] sm:$0xff] }
 0x5d2   :  { %2044 = vmatpush1.msra.mxu0 %v2894_v61  ;;  %2115 = vmatpush1.msra.mxu1 %v2896_v62  ;;  %v3568_v61 = vld [vmem:[#allocation19_spill] sm:$0xff]  ;;  %v3569_v62 = vld [vmem:[#allocation20_spill] sm:$0xff] }
 0x5d3   :  { %2045 = vmatprep.subr.mxu0 %v2900_v63  ;;  %2116 = vmatprep.subr.mxu1 %v2902_v1  ;;  %v3570_v63 = vld [vmem:[#allocation21_spill] sm:$0xff]  ;;  %v3571_v1 = vld [vmem:[#allocation22_spill] sm:$0xff] }
 0x5d4   :  { %2046 = vmatpush1.msra.mxu0 %v2906_v57  ;;  %2117 = vmatpush1.msra.mxu1 %v2908_v12  ;;  %v3572_v57 = vld [vmem:[#allocation23_spill] sm:$0xff]  ;;  %v3573_v12 = vld [vmem:[#allocation24_spill] sm:$0xff] }
 0x5d5   :  { %2047 = vmatprep.subr.mxu0 %v2912_v13  ;;  %2118 = vmatprep.subr.mxu1 %v2914_v14  ;;  %v3574_v13 = vld [vmem:[#allocation25_spill] sm:$0xff]  ;;  %v3575_v14 = vld [vmem:[#allocation26_spill] sm:$0xff] }
 0x5d6   :  { %2048 = vmatpush1.msra.mxu0 %v2918_v15  ;;  %2119 = vmatpush1.msra.mxu1 %v2920_v16  ;;  %v3576_v15 = vld [vmem:[#allocation27_spill] sm:$0xff]  ;;  %v3577_v16 = vld [vmem:[#allocation28_spill] sm:$0xff] }
 0x5d7   :  { %2049 = vmatprep.subr.mxu0 %v2924_v17  ;;  %2120 = vmatprep.subr.mxu1 %v2926_v18  ;;  %v3578_v17 = vld [vmem:[#allocation29_spill] sm:$0xff]  ;;  %v3579_v18 = vld [vmem:[#allocation30_spill] sm:$0xff] }
 0x5d8   :  { %2050 = vmatpush1.msra.mxu0 %v2930_v19  ;;  %2121 = vmatpush1.msra.mxu1 %v2932_v20  ;;  %v3580_v19 = vld [vmem:[#allocation31_spill] sm:$0xff]  ;;  %v3581_v20 = vld [vmem:[#allocation32_spill] sm:$0xff] }
 0x5d9   :  { %2051 = vmatprep.subr.mxu0 %v2936_v21  ;;  %2122 = vmatprep.subr.mxu1 %v2938_v22  ;;  %v3582_v21 = vld [vmem:[#allocation33_spill] sm:$0xff]  ;;  %v3583_v22 = vld [vmem:[#allocation35_spill] sm:$0xff] }
 0x5da   :  { %2052 = vmatpush1.msra.mxu0 %v2942_v23  ;;  %2123 = vmatpush1.msra.mxu1 %v2944_v24  ;;  %v3584_v23 = vld [vmem:[#allocation34_spill] sm:$0xff] }
 0x5db   :  { %2053 = vmatprep.subr.mxu0 %v2948_v25  ;;  %2124 = vmatprep.subr.mxu1 %v2950_v26  ;;  %v1774_v24 = vld [vmem:[#allocation2 + $0x6] ss:$8 sm:$0xf] }
 0x5dc   :  { %2054 = vmatpush1.msra.mxu0 %v2954_v27  ;;  %2125 = vmatpush1.msra.mxu1 %v2956_v28  ;;  %v3585_v25 = vld [vmem:[#allocation36_spill] sm:$0xff] }
 0x5dd   :  { %2055 = vmatprep.subr.mxu0 %v2960_v29  ;;  %2126 = vmatprep.subr.mxu1 %v2962_v30  ;;  %v1779_v26 = vrot.slane %v1774_v24, %v3585_v25  ;;  %v3586_v29 = vld [vmem:[#allocation38_spill] sm:$0xff]  ;;  %v2024_v53 = vrot.slane %v2019_v4, %v3585_v25 }
 0x5de   :  { %2056 = vmatpush1.msra.mxu0 %v2966_v31  ;;  %2127 = vmatpush1.msra.mxu1 %v2968_v32  ;;  %v1783_v30 = vrot.slane %v1774_v24, %v3586_v29  ;;  %v2028_v52 = vrot.slane %v2019_v4, %v3586_v29 }
 0x5df   :  { %2057 = vmatprep.subr.mxu0 %v2972_v33  ;;  %2128 = vmatprep.subr.mxu1 %v2974_v35  ;;  %v3587_v33 = vld [vmem:[#allocation37_spill] sm:$0xff] }
 0x5e0   :  { %2058 = vmatpush1.msra.mxu0 %v2978_v36  ;;  %2129 = vmatpush1.msra.mxu1 %v2980_v37  ;;  %v1787_v35 = vrot.slane %v1774_v24, %v3587_v33  ;;  %v2032_v0 = vrot.slane %v2019_v4, %v3587_v33 }
 0x5e1   :  { %2059 = vmatprep.subr.mxu0 %v2984_v39  ;;  %2130 = vmatprep.subr.mxu1 %v2986_v40  ;;  %v1791_v40 = vrot.slane %v1774_v24, %v2715_v7 }
 0x5e2   :  { %2060 = vmatpush1.msra.mxu0 %v2990_v41  ;;  %2131 = vmatpush1.msra.mxu1 %v2992_v43 }
 0x5e3   :  { %2061 = vmatprep.subr.mxu0 %v2996_v44  ;;  %2132 = vmatprep.subr.mxu1 %v2998_v45 }
 0x5e4   :  { %2062 = vmatpush1.msra.mxu0 %v3002_v46  ;;  %2133 = vmatpush1.msra.mxu1 %v3004_v47 }
 0x5e5   :  { %2063 = vmatprep.subr.mxu0 %v3564_v56  ;;  %2134 = vmatprep.subr.mxu1 %v3565_v55  ;;  %v2036_v56 = vrot.slane %v2019_v4, %v2715_v7 }
 0x5e6   :  { %2064 = vmatpush1.msra.mxu0 %v3566_v9  ;;  %2135 = vmatpush1.msra.mxu1 %v3567_v2 }
 0x5e7   :  { %2065 = vmatprep.subr.mxu0 %v3568_v61  ;;  %2136 = vmatprep.subr.mxu1 %v3569_v62 }
 0x5e8   :  { %2066 = vmatpush1.msra.mxu0 %v3570_v63  ;;  %2137 = vmatpush1.msra.mxu1 %v3571_v1 }
 0x5e9   :  { %2067 = vmatprep.subr.mxu0 %v3572_v57  ;;  %2138 = vmatprep.subr.mxu1 %v3573_v12 }
 0x5ea   :  { %2068 = vmatpush1.msra.mxu0 %v3574_v13  ;;  %2139 = vmatpush1.msra.mxu1 %v3575_v14 }
 0x5eb   :  { %2069 = vmatprep.subr.mxu0 %v3576_v15  ;;  %2140 = vmatprep.subr.mxu1 %v3577_v16 }
 0x5ec   :  { %2070 = vmatpush1.msra.mxu0 %v3578_v17  ;;  %2141 = vmatpush1.msra.mxu1 %v3579_v18 }
 0x5ed   :  { %2071 = vmatprep.subr.mxu0 %v3580_v19  ;;  %2142 = vmatprep.subr.mxu1 %v3581_v20 }
 0x5ee   :  { %2072 = vmatpush1.msra.mxu0 %v3582_v21  ;;  %2105 = vmatprep.mubr.f32.mxu0 %v3583_v22 }
 0x5ef   :  { %2143 = vmatpush1.msra.mxu1 %v3584_v23  ;;  %2176 = vmatprep.mubr.f32.mxu1 %v3583_v22 }
 0x68f   :  { %v1862_v27 = vpop.f32.mrf.mxu0  ;;  %v1933_v31 = vpop.f32.mrf.mxu1 }
 0x690   :  { %v1863_v28 = vadd.f32 %v1862_v27, %v1779_v26  ;;  %v1934_v37 = vadd.f32 %v1933_v31, %v1787_v35 }
 0x691   :  { %v1864_v32 = vpop.f32.mrf.mxu0  ;;  %v1935_v39 = vpop.f32.mrf.mxu1 }
 0x692   :  { %2288 = vtanh.f32 %v1863_v28  ;;  %v1865_v36 = vadd.f32 %v1864_v32, %v1783_v30  ;;  %v1936_v41 = vadd.f32 %v1935_v39, %v1791_v40 }
 0x694   :  { %2290 = vtanh.f32 %v1865_v36 }
 0x695   :  { %2292 = vtanh.f32 %v1934_v37 }
 0x696   :  { %2294 = vtanh.f32 %v1936_v41 }
 0x69f   :  { %v2289_v43 = vpop.eup %2288 }
 0x6a0   :  { %v1942_v44 = vmul.f32 0.5, %v2289_v43 }
 0x6a1   :  { %v2291_v45 = vpop.eup %2290 }
 0x6a2   :  { %v1943_v46 = vadd.f32 0.5, %v1942_v44  ;;  %v1944_v47 = vmul.f32 0.5, %v2291_v45  ;;  %v2293_v42 = vpop.eup %2292 }
 0x6a3   :  { %v2295_v3 = vpop.eup %2294 }
 0x6a4   :  { %v1945_v50 = vadd.f32 0.5, %v1944_v47  ;;  %v1948_v34 = vmul.f32 %v1943_v46, %v3225_v11  ;;  %v1946_v59 = vmul.f32 0.5, %v2295_v3 }
 0x6a6   :  { %v1949_v38 = vmul.f32 %v2293_v42, %v1945_v50  ;;  %v1947_v49 = vadd.f32 0.5, %v1946_v59 }
 0x6a8   :  { %v1950_v60 = vadd.f32 %v1949_v38, %v1948_v34 }
 0x6aa   :  { %2296 = vtanh.f32 %v1950_v60 }
 0x6b7   :  { %v2297_v51 = vpop.eup %2296 }
 0x6b8   :  { %v1952_v58 = vmul.f32 %v2297_v51, %v1947_v49 }
 0x6ba   :  { %1953 = vst [vmem:[#allocation9 + $0x7] sm:$0x1] %v1952_v58  ;;  %2106 = vmatmul.mubr.f32.vlgmr.msra.gmra.mxu0 %v1952_v58  ;;  %2177 = vmatmul.mubr.f32.vlgmr.msra.gmra.mxu1 %v1952_v58 }
 0x77a   :  { %v2107_v54 = vpop.f32.mrf.mxu0  ;;  %v2178_v6 = vpop.f32.mrf.mxu1 }
 0x77b   :  { %v2108_v48 = vadd.f32 %v2107_v54, %v2024_v53  ;;  %v2179_v10 = vadd.f32 %v2178_v6, %v2032_v0 }
 0x77c   :  { %v2109_v11 = vpop.f32.mrf.mxu0  ;;  %v2180_v8 = vpop.f32.mrf.mxu1 }
 0x77d   :  { %2298 = vtanh.f32 %v2108_v48  ;;  %v2110_v5 = vadd.f32 %v2109_v11, %v2028_v52  ;;  %v2181_v55 = vadd.f32 %v2180_v8, %v2036_v56 }
 0x77f   :  { %2300 = vtanh.f32 %v2110_v5 }
 0x780   :  { %2302 = vtanh.f32 %v2179_v10 }
 0x781   :  { %2304 = vtanh.f32 %v2181_v55 }
 0x78a   :  { %v2299_v9 = vpop.eup %2298 }
 0x78b   :  { %v2187_v2 = vmul.f32 0.5, %v2299_v9 }
 0x78c   :  { %v2301_v61 = vpop.eup %2300 }
 0x78d   :  { %v2188_v62 = vadd.f32 0.5, %v2187_v2  ;;  %v2189_v63 = vmul.f32 0.5, %v2301_v61  ;;  %v2303_v57 = vpop.eup %2302 }
 0x78e   :  { %v2305_v15 = vpop.eup %2304 }
 0x78f   :  { %v2190_v1 = vadd.f32 0.5, %v2189_v63  ;;  %v2193_v12 = vmul.f32 %v2188_v62, %v1950_v60  ;;  %v2191_v16 = vmul.f32 0.5, %v2305_v15 }
 0x791   :  { %v2194_v13 = vmul.f32 %v2303_v57, %v2190_v1  ;;  %v2192_v17 = vadd.f32 0.5, %v2191_v16 }
 0x793   :  { %v2195_v14 = vadd.f32 %v2194_v13, %v2193_v12 }
 0x795   :  { %2306 = vtanh.f32 %v2195_v14 }
 0x7a2   :  { %v2307_v18 = vpop.eup %2306 }
 0x7a3   :  { %v2197_v7 = vmul.f32 %v2307_v18, %v2192_v17 }
 0x7a5   :  { %2198 = vst [vmem:[#allocation9 + $0x8] sm:$0x1] %v2197_v7 }
 0x7a6   :  { %2380 = shalt.err (!%p2377_p5)
}
 0x7a7   :  { %s2402_s7 = smov 128   ;;  %s2403_s8 = smov 8  }
 0x7a8   :  { %2210 = dma.vmem_to_hbm [thread:$0]  %s2205_s5, 256, %s3308_s4, [#allocation5], %s2402_s7, %s2402_s7, %s2403_s8  }
 0x7a9   :  { %2393 = dma.done.wait [#allocation5], 256  }
 0x7aa   :  { %2394 = vsyncadd [#allocation5], 4294967040 }
 0x7ab   :  { %2214 = vsyncpa [#allocation4], 1 }
 0x7ac   :  { %2215 = vsyncpa [#allocation7], 1 }
 0x7ad   :  { %2216 = vsyncpa [#allocation5], 1 }

</bundles_post_ra>
